<compile_context>
chip_gen: v5e
topology: v5e:2x2
jax: 0.10.0
libtpu: 0.0.40
codegen_flags: <defaults>
</compile_context>

<pallas_src>
import functools

import jax
import jax.numpy as jnp
from jax.experimental import pallas as pl
from jax.experimental.pallas import tpu as pltpu

EPS = 1e-5  # nn.LayerNorm default


def _layer_norm_f32(x, g, b):
    mean = jnp.mean(x, axis=-1, keepdims=True)
    c = x - mean
    var = jnp.mean(c * c, axis=-1, keepdims=True)
    return c * jax.lax.rsqrt(var + EPS) * g + b


def _softmax_rows_f32(logits):
    m = jnp.max(logits, axis=-1, keepdims=True)
    ex = jnp.exp(logits - m)
    s = jnp.sum(ex, axis=-1, keepdims=True)
    r = pl.reciprocal(s, approx=True)   # EUP slot (nearly free)
    r = r * (2.0 - s * r)               # one Newton step -> ~f32 accuracy
    return ex * r


# ----------------------------------------------------------------------------
# Fused decoder-stack kernel: grid = (num_layers,), batch folded into rows
# ----------------------------------------------------------------------------
def _decoder_stack_kernel(
        x_emb_ref, enc_ref, mask_ref,
        self_fc_ref, norm_g_ref, norm_b_ref,
        ca_fc_ref, norm1_g_ref, norm1_b_ref,
        ff_w1_ref, ff_b1_ref, ff_w2_ref, ff_b2_ref,
        norm2_g_ref, norm2_b_ref,
        x_out_ref,
        ctx_scr,
        *, N, L, Lk, H, D, scale, cdt):
    """One grid step == one DecoderBlock applied to the whole (N*L, E) batch.

    x_out_ref (constant block index over the sequential layer axis) stays
    resident in VMEM: it carries the activations between layer iterations and
    is only written back to HBM once, after the last layer.
    """
    l = pl.program_id(0)

    @pl.when(l == 0)
    def _():
        x_out_ref[...] = x_emb_ref[...]

    x = x_out_ref[...]          # (N*L, E) float32 activations
    enc = enc_ref[...]          # (N*Lk, E) compute dtype (keys == values)

    def attention(xq, xkv, kv_len, w_fc, use_mask):
        # SelfAttention.forward: head split -> energy -> masked_fill(mask==0)
        # -> softmax(energy * sqrt(E))   [reference's `/ embed_size**(-1/2)`
        #    quirk, reproduced exactly]  -> context -> fc_out (bias=False).
        # The values/keys/queries nn.Linear layers are never applied in the
        # reference forward(), so neither are they here.
        # Per-head contexts are written into column slices of ctx_scr so
        # fc_out is ONE K=E matmul (no per-head K=D fold / live accumulator).
        for n in range(N):                                # static, unrolled
            q_n = xq[n * L:(n + 1) * L, :]
            kv_n = xkv[n * kv_len:(n + 1) * kv_len, :]
            if use_mask:
                mzero = mask_ref[n] == 0.0                # hoisted out of head loop
            for h in range(H):                            # static, unrolled
                qh = q_n[:, h * D:(h + 1) * D].astype(cdt)
                kh = kv_n[:, h * D:(h + 1) * D].astype(cdt)
                energy = jax.lax.dot_general(             # (L, kv_len) f32
                    qh, kh, (((1,), (1,)), ((), ())),
                    preferred_element_type=jnp.float32)
                if use_mask:
                    energy = jnp.where(mzero, jnp.float32(-1e20), energy)
                p = _softmax_rows_f32(energy * scale)
                ctx_h = jnp.dot(p.astype(cdt), kh,
                                preferred_element_type=jnp.float32)  # (L, D)
                ctx_scr[n * L:(n + 1) * L, h * D:(h + 1) * D] = ctx_h
        return jnp.dot(ctx_scr[...].astype(cdt), w_fc,
                       preferred_element_type=jnp.float32)           # (N*L, E)

    # --- DecoderBlock: masked self-attention + residual LayerNorm ----------
    attn = attention(x, x, L, self_fc_ref[0], True)
    query = _layer_norm_f32(x + attn, norm_g_ref[0], norm_b_ref[0])

    # --- Transformer_block: cross-attn (value = key = enc_out) --------------
    # TODO(synk): reference calls transformer_block(value, key, query) without
    # a mask argument (would raise in PyTorch); mask treated as None here.
    attn2 = attention(query, enc, Lk, ca_fc_ref[0], False)
    h1 = _layer_norm_f32(attn2 + query, norm1_g_ref[0], norm1_b_ref[0])

    hid = jnp.dot(h1.astype(cdt), ff_w1_ref[0],
                  preferred_element_type=jnp.float32) + ff_b1_ref[0]
    hid = jnp.maximum(hid, 0.0)
    ffn = jnp.dot(hid.astype(cdt), ff_w2_ref[0],
                  preferred_element_type=jnp.float32) + ff_b2_ref[0]
    x_out_ref[...] = _layer_norm_f32(ffn + h1, norm2_g_ref[0], norm2_b_ref[0])


# ----------------------------------------------------------------------------
# Final vocab projection (its own pallas_call; lane-dense padded output)
# ----------------------------------------------------------------------------
def _out_proj_kernel(x_ref, w_ref, b_ref, o_ref, *, cdt):
    o_ref[...] = (jnp.dot(x_ref[...].astype(cdt), w_ref[...],
                          preferred_element_type=jnp.float32) + b_ref[...])


# ----------------------------------------------------------------------------
# Wrapper: embedding lookup (plain JAX gather) + two pallas_calls
# ----------------------------------------------------------------------------
def decoder_forward(params, x_tokens, enc_out, trg_mask,
                    compute_dtype=jnp.bfloat16):
    N, L = x_tokens.shape
    E = params['tok_emb'].shape[1]
    H = params['heads']
    D = E // H
    Lk = enc_out.shape[1]
    num_layers = len(params['layers'])
    FF = params['layers'][0]['tb']['ff_w1'].shape[1]
    trg_size = params['out_w'].shape[1]
    cdt = compute_dtype

    # Embedding gathers + position add in plain JAX (dropout p=0 -> identity).
    pos = jnp.arange(L, dtype=jnp.int32)
    x_emb = params['tok_emb'][x_tokens] + params['pos_emb'][pos][None, :, :]
    x_emb2d = x_emb.reshape(N * L, E).astype(jnp.float32)
    enc2d = enc_out.reshape(N * Lk, E).astype(cdt)     # keys == values, cast once
    mask3d = trg_mask.reshape(N, L, L).astype(jnp.float32)

    # Per-layer weights stacked on a leading layer axis: selected by the
    # BlockSpec index_map and auto-prefetched while the previous layer runs.
    # MXU operands in bf16; LayerNorm params and biases stay f32.
    def stack(fn, dtype):
        return jnp.stack([fn(p) for p in params['layers']], 0).astype(dtype)

    self_fc = stack(lambda p: p['self_fc'], cdt)
    norm_g = stack(lambda p: p['norm_g'], jnp.float32).reshape(num_layers, 1, E)
    norm_b = stack(lambda p: p['norm_b'], jnp.float32).reshape(num_layers, 1, E)
    ca_fc = stack(lambda p: p['tb']['attn_fc'], cdt)
    norm1_g = stack(lambda p: p['tb']['norm1_g'], jnp.float32).reshape(num_layers, 1, E)
    norm1_b = stack(lambda p: p['tb']['norm1_b'], jnp.float32).reshape(num_layers, 1, E)
    ff_w1 = stack(lambda p: p['tb']['ff_w1'], cdt)
    ff_b1 = stack(lambda p: p['tb']['ff_b1'], jnp.float32).reshape(num_layers, 1, FF)
    ff_w2 = stack(lambda p: p['tb']['ff_w2'], cdt)
    ff_b2 = stack(lambda p: p['tb']['ff_b2'], jnp.float32).reshape(num_layers, 1, E)
    norm2_g = stack(lambda p: p['tb']['norm2_g'], jnp.float32).reshape(num_layers, 1, E)
    norm2_b = stack(lambda p: p['tb']['norm2_b'], jnp.float32).reshape(num_layers, 1, E)

    kernel = functools.partial(
        _decoder_stack_kernel,
        N=N, L=L, Lk=Lk, H=H, D=D, scale=float(E) ** 0.5, cdt=cdt)

    const2 = lambda l: (0, 0)        # batch-folded activations / encoder rows
    const3 = lambda l: (0, 0, 0)     # full-batch mask
    wsel = lambda l: (l, 0, 0)       # per-layer weight selection

    x_final = pl.pallas_call(
        kernel,
        grid=(num_layers,),
        in_specs=[
            pl.BlockSpec((N * L, E), const2),        # embedded inputs
            pl.BlockSpec((N * Lk, E), const2),       # encoder output (K == V)
            pl.BlockSpec((N, L, L), const3),         # trg_mask
            pl.BlockSpec((1, E, E), wsel),           # self-attn fc_out
            pl.BlockSpec((1, 1, E), wsel),           # DecoderBlock.norm gamma
            pl.BlockSpec((1, 1, E), wsel),           # DecoderBlock.norm beta
            pl.BlockSpec((1, E, E), wsel),           # cross-attn fc_out
            pl.BlockSpec((1, 1, E), wsel),           # norm1 gamma
            pl.BlockSpec((1, 1, E), wsel),           # norm1 beta
            pl.BlockSpec((1, E, FF), wsel),          # ff_w1
            pl.BlockSpec((1, 1, FF), wsel),          # ff_b1
            pl.BlockSpec((1, FF, E), wsel),          # ff_w2
            pl.BlockSpec((1, 1, E), wsel),           # ff_b2
            pl.BlockSpec((1, 1, E), wsel),           # norm2 gamma
            pl.BlockSpec((1, 1, E), wsel),           # norm2 beta
        ],
        out_specs=pl.BlockSpec((N * L, E), const2),
        out_shape=jax.ShapeDtypeStruct((N * L, E), jnp.float32),
        scratch_shapes=[pltpu.VMEM((N * L, E), jnp.float32)],  # per-head ctx
        compiler_params=pltpu.CompilerParams(
            dimension_semantics=("arbitrary",)),     # layer axis is sequential
    )(x_emb2d, enc2d, mask3d,
      self_fc, norm_g, norm_b,
      ca_fc, norm1_g, norm1_b,
      ff_w1, ff_b1, ff_w2, ff_b2,
      norm2_g, norm2_b)

    # Decoder.fc_out as its own pallas_call so out_w is not kept resident in
    # VMEM during the layer stack; output padded to a lane-dense 128 columns.
    out_pad = ((trg_size + 127) // 128) * 128
    out_w = (jnp.zeros((E, out_pad), jnp.float32)
             .at[:, :trg_size].set(params['out_w']).astype(cdt))
    out_b = (jnp.zeros((1, out_pad), jnp.float32)
             .at[:, :trg_size].set(params['out_b']))

    logits = pl.pallas_call(
        functools.partial(_out_proj_kernel, cdt=cdt),
        out_shape=jax.ShapeDtypeStruct((N * L, out_pad), jnp.float32),
    )(x_final, out_w, out_b)

    return logits[:, :trg_size].reshape(N, L, trg_size)


# ----------------------------------------------------------------------------
# Pure-JAX reference.  `dt` controls the operand dtype at every matmul
# boundary: float32 == exact module semantics; bfloat16 == the same cast
# points as the kernel (accumulation stays f32 in both).
# ----------------------------------------------------------------------------
def _ref_dot(a, b, dt):
    return jnp.dot(a.astype(dt), b.astype(dt),
                   preferred_element_type=jnp.float32)


def _ref_attention(values, keys, query, mask, w_fc, E, H, dt):
    N, Lq, _ = query.shape
    Lk = keys.shape[1]
    D = E // H
    q = query.reshape(N, Lq, H, D).astype(dt)
    k = keys.reshape(N, Lk, H, D).astype(dt)
    v = values.reshape(N, Lk, H, D).astype(dt)
    energy = jnp.einsum('nqhd,nkhd->nhqk', q, k,
                        preferred_element_type=jnp.float32)
    if mask is not None:
        energy = jnp.where(mask == 0, -1e20, energy)
    attn = jax.nn.softmax(energy * (float(E) ** 0.5), axis=3)
    out = jnp.einsum('nhqk,nkhd->nqhd', attn.astype(dt), v,
                     preferred_element_type=jnp.float32).reshape(N, Lq, E)
    return _ref_dot(out, w_fc, dt)


def _ref_ln(s, g, b):
    mean = s.mean(-1, keepdims=True)
    var = ((s - mean) ** 2).mean(-1, keepdims=True)
    return (s - mean) / jnp.sqrt(var + EPS) * g + b


def ref_decoder_forward(params, x_tokens, enc_out, trg_mask, dt=jnp.float32):
    N, L = x_tokens.shape
    E = params['tok_emb'].shape[1]
    H = params['heads']
    x = params['tok_emb'][x_tokens] + params['pos_emb'][jnp.arange(L)][None]
    for p in params['layers']:
        attn = _ref_attention(x, x, x, trg_mask, p['self_fc'], E, H, dt)
        query = _ref_ln(x + attn, p['norm_g'], p['norm_b'])
        tb = p['tb']
        attn2 = _ref_attention(enc_out, enc_out, query, None, tb['attn_fc'],
                               E, H, dt)
        h = _ref_ln(attn2 + query, tb['norm1_g'], tb['norm1_b'])
        hid = jnp.maximum(_ref_dot(h, tb['ff_w1'], dt) + tb['ff_b1'], 0.0)
        fwd = _ref_dot(hid, tb['ff_w2'], dt) + tb['ff_b2']
        x = _ref_ln(fwd + h, tb['norm2_g'], tb['norm2_b'])
    return _ref_dot(x, params['out_w'], dt) + params['out_b']


# ----------------------------------------------------------------------------
# Deterministic parameter init
# ----------------------------------------------------------------------------
def init_params(key, trg_size, embed_size, num_layers, heads, forward_expansion,
                max_length):
    def lin(k, fin, fout):
        return jax.random.normal(k, (fin, fout), jnp.float32) / jnp.sqrt(fin)

    keys = jax.random.split(key, 4 + num_layers * 4)
    E = embed_size
    params = {
        'heads': heads,
        'tok_emb': jax.random.normal(keys[0], (trg_size, E), jnp.float32) * 0.1,
        'pos_emb': jax.random.normal(keys[1], (max_length, E), jnp.float32) * 0.1,
        'out_w': lin(keys[2], E, trg_size),
        'out_b': jax.random.normal(keys[3], (trg_size,), jnp.float32) * 0.01,
        'layers': [],
    }
    for li in range(num_layers):
        k0, k1, k2, k3 = keys[4 + 4 * li: 4 + 4 * (li + 1)]
        params['layers'].append({
            'self_fc': lin(k0, E, E),
            'norm_g': jnp.ones((E,), jnp.float32),
            'norm_b': jnp.zeros((E,), jnp.float32),
            'tb': {
                'attn_fc': lin(k1, E, E),
                'norm1_g': jnp.ones((E,), jnp.float32),
                'norm1_b': jnp.zeros((E,), jnp.float32),
                'norm2_g': jnp.ones((E,), jnp.float32),
                'norm2_b': jnp.zeros((E,), jnp.float32),
                'ff_w1': lin(k2, E, forward_expansion * E),
                'ff_b1': jnp.zeros((forward_expansion * E,), jnp.float32),
                'ff_w2': lin(k3, forward_expansion * E, E),
                'ff_b2': jnp.zeros((E,), jnp.float32),
            },
        })
    return params


# ----------------------------------------------------------------------------
if __name__ == "__main__":
    trg_size = 10
    embed_size = 32
    num_layers = 2
    heads = 4
    forward_expansion = 4
    max_length = 64

    N, L = 2, 8        # batch, target sequence length
    Lk = 8             # encoder sequence length

    root = jax.random.PRNGKey(0)
    k_param, k_tok, k_enc = jax.random.split(root, 3)

    params = init_params(k_param, trg_size, embed_size, num_layers, heads,
                         forward_expansion, max_length)

    x_tokens = jax.random.randint(k_tok, (N, L), 0, trg_size, dtype=jnp.int32)
    enc_out = jax.random.normal(k_enc, (N, Lk, embed_size), jnp.float32)
    trg_mask = jnp.broadcast_to(
        jnp.tril(jnp.ones((L, L), jnp.float32))[None, None], (N, 1, L, L))

    out = decoder_forward(params, x_tokens, enc_out, trg_mask,
                          compute_dtype=jnp.bfloat16)
    out = jax.block_until_ready(out)
    assert out.shape == (N, L, trg_size), out.shape

    # Correctness check against a pure-JAX reference that casts operands to
    # bf16 at the same matmul boundaries (accumulation f32 in both), so the
    # comparison has no precision ambiguity.  The tolerance is governed by the
    # module's softmax(energy * sqrt(E)) quirk: near-tied rows of the very
    # peaky softmax can amplify one-ulp rounding differences in intermediates,
    # not by kernel precision (approx reciprocal is Newton-refined).  Genuine
    # semantic bugs (mask / scale / head slicing / layer order) produce errors
    # orders of magnitude larger than this bound.
    ref_bf16 = ref_decoder_forward(params, x_tokens, enc_out, trg_mask,
                                   dt=jnp.bfloat16)
    max_err = float(jnp.max(jnp.abs(out - ref_bf16)))
    assert jnp.allclose(out, ref_bf16, rtol=1e-2, atol=1e-2), max_err
    # (ref_decoder_forward(..., dt=jnp.float32) gives the exact-f32 module
    #  semantics; run decoder_forward(..., compute_dtype=jnp.float32) to
    #  compare against it if full-precision behaviour is required.)

    print("KERNEL_OK")
</pallas_src>

<mosaic_0001>
module attributes {stable_mosaic.version = 11 : i64} {
  func.func @_decoder_stack_kernel(%arg0: i32, %arg1: memref<16x32xf32, #tpu.memory_space<vmem>>, %arg2: memref<16x32xbf16, #tpu.memory_space<vmem>>, %arg3: memref<2x8x8xf32, #tpu.memory_space<vmem>>, %arg4: memref<1x32x32xbf16, #tpu.memory_space<vmem>>, %arg5: memref<1x1x32xf32, #tpu.memory_space<vmem>>, %arg6: memref<1x1x32xf32, #tpu.memory_space<vmem>>, %arg7: memref<1x32x32xbf16, #tpu.memory_space<vmem>>, %arg8: memref<1x1x32xf32, #tpu.memory_space<vmem>>, %arg9: memref<1x1x32xf32, #tpu.memory_space<vmem>>, %arg10: memref<1x32x128xbf16, #tpu.memory_space<vmem>>, %arg11: memref<1x1x128xf32, #tpu.memory_space<vmem>>, %arg12: memref<1x128x32xbf16, #tpu.memory_space<vmem>>, %arg13: memref<1x1x32xf32, #tpu.memory_space<vmem>>, %arg14: memref<1x1x32xf32, #tpu.memory_space<vmem>>, %arg15: memref<1x1x32xf32, #tpu.memory_space<vmem>>, %arg16: memref<16x32xf32, #tpu.memory_space<vmem>>, %arg17: memref<16x32xf32, #tpu.memory_space<vmem>>) attributes {dimension_semantics = [#tpu.dimension_semantics<arbitrary>], iteration_bounds = array<i64: 2>, scalar_prefetch = 0 : i64, scratch_operands = 1 : i64, tpu.core_type = #tpu.core_type<tc>, window_params = [{pipeline_mode = #tpu.pipeline_mode<synchronous>, transform_indices = @transform_0, window_bounds = array<i64: 16, 32>}, {pipeline_mode = #tpu.pipeline_mode<synchronous>, transform_indices = @transform_1, window_bounds = array<i64: 16, 32>}, {pipeline_mode = #tpu.pipeline_mode<synchronous>, transform_indices = @transform_2, window_bounds = array<i64: 2, 8, 8>}, {transform_indices = @transform_3, window_bounds = array<i64: 1, 32, 32>}, {transform_indices = @transform_4, window_bounds = array<i64: 1, 1, 32>}, {transform_indices = @transform_5, window_bounds = array<i64: 1, 1, 32>}, {transform_indices = @transform_6, window_bounds = array<i64: 1, 32, 32>}, {transform_indices = @transform_7, window_bounds = array<i64: 1, 1, 32>}, {transform_indices = @transform_8, window_bounds = array<i64: 1, 1, 32>}, {transform_indices = @transform_9, window_bounds = array<i64: 1, 32, 128>}, {transform_indices = @transform_10, window_bounds = array<i64: 1, 1, 128>}, {transform_indices = @transform_11, window_bounds = array<i64: 1, 128, 32>}, {transform_indices = @transform_12, window_bounds = array<i64: 1, 1, 32>}, {transform_indices = @transform_13, window_bounds = array<i64: 1, 1, 32>}, {transform_indices = @transform_14, window_bounds = array<i64: 1, 1, 32>}, {pipeline_mode = #tpu.pipeline_mode<synchronous>, transform_indices = @transform_15, window_bounds = array<i64: 16, 32>}]} {
    %c0_i32 = arith.constant 0 : i32
    %0 = arith.cmpi eq, %arg0, %c0_i32 : i32
    %1 = arith.extui %0 : i1 to i32
    %c0_i32_0 = arith.constant 0 : i32
    %2 = arith.cmpi ne, %1, %c0_i32_0 : i32
    scf.if %2 {
      %c0_205 = arith.constant 0 : index
      %c0_206 = arith.constant 0 : index
      %517 = vector.load %arg1[%c0_205, %c0_206] : memref<16x32xf32, #tpu.memory_space<vmem>>, vector<16x32xf32>
      %c0_207 = arith.constant 0 : index
      %c0_208 = arith.constant 0 : index
      %518 = vector.load %arg16[%c0_207, %c0_208] : memref<16x32xf32, #tpu.memory_space<vmem>>, vector<16x32xf32>
      tpu.vector_store %arg16[%c0_207, %c0_208], %517 {strides = array<i32>} : memref<16x32xf32, #tpu.memory_space<vmem>>, vector<16x32xf32>,
    } else {
    }
    %c0 = arith.constant 0 : index
    %c0_1 = arith.constant 0 : index
    %3 = vector.load %arg16[%c0, %c0_1] : memref<16x32xf32, #tpu.memory_space<vmem>>, vector<16x32xf32>
    %c0_2 = arith.constant 0 : index
    %c0_3 = arith.constant 0 : index
    %4 = vector.load %arg2[%c0_2, %c0_3] : memref<16x32xbf16, #tpu.memory_space<vmem>>, vector<16x32xbf16>
    %c0_4 = arith.constant 0 : index
    %c0_5 = arith.constant 0 : index
    %c0_6 = arith.constant 0 : index
    %5 = vector.load %arg4[%c0_4, %c0_5, %c0_6] : memref<1x32x32xbf16, #tpu.memory_space<vmem>>, vector<1x32x32xbf16>
    %6 = vector.shape_cast %5 : vector<1x32x32xbf16> to vector<32x32xbf16>
    %7 = vector.extract_strided_slice %3 {offsets = [0, 0], sizes = [8, 32], strides = [1, 1]} : vector<16x32xf32> to vector<8x32xf32>
    %8 = vector.extract_strided_slice %3 {offsets = [0, 0], sizes = [8, 32], strides = [1, 1]} : vector<16x32xf32> to vector<8x32xf32>
    %c0_7 = arith.constant 0 : index
    %c0_8 = arith.constant 0 : index
    %c0_9 = arith.constant 0 : index
    %9 = vector.load %arg3[%c0_7, %c0_8, %c0_9] : memref<2x8x8xf32, #tpu.memory_space<vmem>>, vector<1x8x8xf32>
    %10 = vector.shape_cast %9 : vector<1x8x8xf32> to vector<8x8xf32>
    %cst = arith.constant 0.000000e+00 : f32
    %11 = vector.broadcast %cst : f32 to vector<8x8xf32>
    %12 = arith.cmpf oeq, %10, %11 : vector<8x8xf32>
    %13 = vector.extract_strided_slice %7 {offsets = [0, 0], sizes = [8, 8], strides = [1, 1]} : vector<8x32xf32> to vector<8x8xf32>
    %14 = arith.truncf %13 : vector<8x8xf32> to vector<8x8xbf16>
    %15 = vector.extract_strided_slice %8 {offsets = [0, 0], sizes = [8, 8], strides = [1, 1]} : vector<8x32xf32> to vector<8x8xf32>
    %16 = arith.truncf %15 : vector<8x8xf32> to vector<8x8xbf16>
    %cst_10 = arith.constant dense<0.000000e+00> : vector<8x8xf32>
    %17 = tpu.matmul %14, %16, %cst_10 {dimension_numbers = #tpu.dot_dimension_numbers<[1], [1], [0], [0], [0, 0, 1, 0], [], []>} : vector<8x8xbf16>, vector<8x8xbf16>, vector<8x8xf32> -> vector<8x8xf32>
    %cst_11 = arith.constant -1.000000e+20 : f32
    %18 = vector.broadcast %cst_11 : f32 to vector<8x8xf32>
    %19 = arith.select %12, %18, %17 : vector<8x8xi1>, vector<8x8xf32>
    %cst_12 = arith.constant 5.65685415 : f32
    %20 = vector.broadcast %cst_12 : f32 to vector<8x8xf32>
    %21 = arith.mulf %19, %20 : vector<8x8xf32>
    %cst_13 = arith.constant dense<0xFF800000> : vector<8xf32>
    %22 = vector.multi_reduction <maximumf>, %21, %cst_13 [1] : vector<8x8xf32> to vector<8xf32>
    %23 = vector.shape_cast %22 : vector<8xf32> to vector<8x1xf32>
    %24 = vector.broadcast %23 : vector<8x1xf32> to vector<8x8xf32>
    %25 = arith.subf %21, %24 : vector<8x8xf32>
    %26 = math.exp %25 : vector<8x8xf32>
    %cst_14 = arith.constant dense<0.000000e+00> : vector<8xf32>
    %27 = vector.multi_reduction <add>, %26, %cst_14 [1] : vector<8x8xf32> to vector<8xf32>
    %28 = vector.shape_cast %27 : vector<8xf32> to vector<8x1xf32>
    %29 = tpu.reciprocal %28 {approx = true} : vector<8x1xf32> -> vector<8x1xf32>
    %30 = arith.mulf %28, %29 : vector<8x1xf32>
    %cst_15 = arith.constant 2.000000e+00 : f32
    %31 = vector.broadcast %cst_15 : f32 to vector<8x1xf32>
    %32 = arith.subf %31, %30 : vector<8x1xf32>
    %33 = arith.mulf %29, %32 : vector<8x1xf32>
    %34 = vector.broadcast %33 : vector<8x1xf32> to vector<8x8xf32>
    %35 = arith.mulf %26, %34 : vector<8x8xf32>
    %36 = arith.truncf %35 : vector<8x8xf32> to vector<8x8xbf16>
    %cst_16 = arith.constant dense<0.000000e+00> : vector<8x8xf32>
    %37 = tpu.matmul %36, %16, %cst_16 {dimension_numbers = #tpu.dot_dimension_numbers<[1], [0], [0], [1], [0, 0, 1, 1], [], []>} : vector<8x8xbf16>, vector<8x8xbf16>, vector<8x8xf32> -> vector<8x8xf32>
    %c0_17 = arith.constant 0 : index
    %c0_18 = arith.constant 0 : index
    %38 = vector.load %arg17[%c0_17, %c0_18] : memref<16x32xf32, #tpu.memory_space<vmem>>, vector<8x8xf32>
    tpu.vector_store %arg17[%c0_17, %c0_18], %37 {strides = array<i32>} : memref<16x32xf32, #tpu.memory_space<vmem>>, vector<8x8xf32>,
    %39 = vector.extract_strided_slice %7 {offsets = [0, 8], sizes = [8, 8], strides = [1, 1]} : vector<8x32xf32> to vector<8x8xf32>
    %40 = arith.truncf %39 : vector<8x8xf32> to vector<8x8xbf16>
    %41 = vector.extract_strided_slice %8 {offsets = [0, 8], sizes = [8, 8], strides = [1, 1]} : vector<8x32xf32> to vector<8x8xf32>
    %42 = arith.truncf %41 : vector<8x8xf32> to vector<8x8xbf16>
    %cst_19 = arith.constant dense<0.000000e+00> : vector<8x8xf32>
    %43 = tpu.matmul %40, %42, %cst_19 {dimension_numbers = #tpu.dot_dimension_numbers<[1], [1], [0], [0], [0, 0, 1, 0], [], []>} : vector<8x8xbf16>, vector<8x8xbf16>, vector<8x8xf32> -> vector<8x8xf32>
    %cst_20 = arith.constant -1.000000e+20 : f32
    %44 = vector.broadcast %cst_20 : f32 to vector<8x8xf32>
    %45 = arith.select %12, %44, %43 : vector<8x8xi1>, vector<8x8xf32>
    %cst_21 = arith.constant 5.65685415 : f32
    %46 = vector.broadcast %cst_21 : f32 to vector<8x8xf32>
    %47 = arith.mulf %45, %46 : vector<8x8xf32>
    %cst_22 = arith.constant dense<0xFF800000> : vector<8xf32>
    %48 = vector.multi_reduction <maximumf>, %47, %cst_22 [1] : vector<8x8xf32> to vector<8xf32>
    %49 = vector.shape_cast %48 : vector<8xf32> to vector<8x1xf32>
    %50 = vector.broadcast %49 : vector<8x1xf32> to vector<8x8xf32>
    %51 = arith.subf %47, %50 : vector<8x8xf32>
    %52 = math.exp %51 : vector<8x8xf32>
    %cst_23 = arith.constant dense<0.000000e+00> : vector<8xf32>
    %53 = vector.multi_reduction <add>, %52, %cst_23 [1] : vector<8x8xf32> to vector<8xf32>
    %54 = vector.shape_cast %53 : vector<8xf32> to vector<8x1xf32>
    %55 = tpu.reciprocal %54 {approx = true} : vector<8x1xf32> -> vector<8x1xf32>
    %56 = arith.mulf %54, %55 : vector<8x1xf32>
    %cst_24 = arith.constant 2.000000e+00 : f32
    %57 = vector.broadcast %cst_24 : f32 to vector<8x1xf32>
    %58 = arith.subf %57, %56 : vector<8x1xf32>
    %59 = arith.mulf %55, %58 : vector<8x1xf32>
    %60 = vector.broadcast %59 : vector<8x1xf32> to vector<8x8xf32>
    %61 = arith.mulf %52, %60 : vector<8x8xf32>
    %62 = arith.truncf %61 : vector<8x8xf32> to vector<8x8xbf16>
    %cst_25 = arith.constant dense<0.000000e+00> : vector<8x8xf32>
    %63 = tpu.matmul %62, %42, %cst_25 {dimension_numbers = #tpu.dot_dimension_numbers<[1], [0], [0], [1], [0, 0, 1, 1], [], []>} : vector<8x8xbf16>, vector<8x8xbf16>, vector<8x8xf32> -> vector<8x8xf32>
    %c0_26 = arith.constant 0 : index
    %c8 = arith.constant 8 : index
    %64 = vector.load %arg17[%c0_26, %c8] : memref<16x32xf32, #tpu.memory_space<vmem>>, vector<8x8xf32>
    tpu.vector_store %arg17[%c0_26, %c8], %63 {strides = array<i32>} : memref<16x32xf32, #tpu.memory_space<vmem>>, vector<8x8xf32>,
    %65 = vector.extract_strided_slice %7 {offsets = [0, 16], sizes = [8, 8], strides = [1, 1]} : vector<8x32xf32> to vector<8x8xf32>
    %66 = arith.truncf %65 : vector<8x8xf32> to vector<8x8xbf16>
    %67 = vector.extract_strided_slice %8 {offsets = [0, 16], sizes = [8, 8], strides = [1, 1]} : vector<8x32xf32> to vector<8x8xf32>
    %68 = arith.truncf %67 : vector<8x8xf32> to vector<8x8xbf16>
    %cst_27 = arith.constant dense<0.000000e+00> : vector<8x8xf32>
    %69 = tpu.matmul %66, %68, %cst_27 {dimension_numbers = #tpu.dot_dimension_numbers<[1], [1], [0], [0], [0, 0, 1, 0], [], []>} : vector<8x8xbf16>, vector<8x8xbf16>, vector<8x8xf32> -> vector<8x8xf32>
    %cst_28 = arith.constant -1.000000e+20 : f32
    %70 = vector.broadcast %cst_28 : f32 to vector<8x8xf32>
    %71 = arith.select %12, %70, %69 : vector<8x8xi1>, vector<8x8xf32>
    %cst_29 = arith.constant 5.65685415 : f32
    %72 = vector.broadcast %cst_29 : f32 to vector<8x8xf32>
    %73 = arith.mulf %71, %72 : vector<8x8xf32>
    %cst_30 = arith.constant dense<0xFF800000> : vector<8xf32>
    %74 = vector.multi_reduction <maximumf>, %73, %cst_30 [1] : vector<8x8xf32> to vector<8xf32>
    %75 = vector.shape_cast %74 : vector<8xf32> to vector<8x1xf32>
    %76 = vector.broadcast %75 : vector<8x1xf32> to vector<8x8xf32>
    %77 = arith.subf %73, %76 : vector<8x8xf32>
    %78 = math.exp %77 : vector<8x8xf32>
    %cst_31 = arith.constant dense<0.000000e+00> : vector<8xf32>
    %79 = vector.multi_reduction <add>, %78, %cst_31 [1] : vector<8x8xf32> to vector<8xf32>
    %80 = vector.shape_cast %79 : vector<8xf32> to vector<8x1xf32>
    %81 = tpu.reciprocal %80 {approx = true} : vector<8x1xf32> -> vector<8x1xf32>
    %82 = arith.mulf %80, %81 : vector<8x1xf32>
    %cst_32 = arith.constant 2.000000e+00 : f32
    %83 = vector.broadcast %cst_32 : f32 to vector<8x1xf32>
    %84 = arith.subf %83, %82 : vector<8x1xf32>
    %85 = arith.mulf %81, %84 : vector<8x1xf32>
    %86 = vector.broadcast %85 : vector<8x1xf32> to vector<8x8xf32>
    %87 = arith.mulf %78, %86 : vector<8x8xf32>
    %88 = arith.truncf %87 : vector<8x8xf32> to vector<8x8xbf16>
    %cst_33 = arith.constant dense<0.000000e+00> : vector<8x8xf32>
    %89 = tpu.matmul %88, %68, %cst_33 {dimension_numbers = #tpu.dot_dimension_numbers<[1], [0], [0], [1], [0, 0, 1, 1], [], []>} : vector<8x8xbf16>, vector<8x8xbf16>, vector<8x8xf32> -> vector<8x8xf32>
    %c0_34 = arith.constant 0 : index
    %c16 = arith.constant 16 : index
    %90 = vector.load %arg17[%c0_34, %c16] : memref<16x32xf32, #tpu.memory_space<vmem>>, vector<8x8xf32>
    tpu.vector_store %arg17[%c0_34, %c16], %89 {strides = array<i32>} : memref<16x32xf32, #tpu.memory_space<vmem>>, vector<8x8xf32>,
    %91 = vector.extract_strided_slice %7 {offsets = [0, 24], sizes = [8, 8], strides = [1, 1]} : vector<8x32xf32> to vector<8x8xf32>
    %92 = arith.truncf %91 : vector<8x8xf32> to vector<8x8xbf16>
    %93 = vector.extract_strided_slice %8 {offsets = [0, 24], sizes = [8, 8], strides = [1, 1]} : vector<8x32xf32> to vector<8x8xf32>
    %94 = arith.truncf %93 : vector<8x8xf32> to vector<8x8xbf16>
    %cst_35 = arith.constant dense<0.000000e+00> : vector<8x8xf32>
    %95 = tpu.matmul %92, %94, %cst_35 {dimension_numbers = #tpu.dot_dimension_numbers<[1], [1], [0], [0], [0, 0, 1, 0], [], []>} : vector<8x8xbf16>, vector<8x8xbf16>, vector<8x8xf32> -> vector<8x8xf32>
    %cst_36 = arith.constant -1.000000e+20 : f32
    %96 = vector.broadcast %cst_36 : f32 to vector<8x8xf32>
    %97 = arith.select %12, %96, %95 : vector<8x8xi1>, vector<8x8xf32>
    %cst_37 = arith.constant 5.65685415 : f32
    %98 = vector.broadcast %cst_37 : f32 to vector<8x8xf32>
    %99 = arith.mulf %97, %98 : vector<8x8xf32>
    %cst_38 = arith.constant dense<0xFF800000> : vector<8xf32>
    %100 = vector.multi_reduction <maximumf>, %99, %cst_38 [1] : vector<8x8xf32> to vector<8xf32>
    %101 = vector.shape_cast %100 : vector<8xf32> to vector<8x1xf32>
    %102 = vector.broadcast %101 : vector<8x1xf32> to vector<8x8xf32>
    %103 = arith.subf %99, %102 : vector<8x8xf32>
    %104 = math.exp %103 : vector<8x8xf32>
    %cst_39 = arith.constant dense<0.000000e+00> : vector<8xf32>
    %105 = vector.multi_reduction <add>, %104, %cst_39 [1] : vector<8x8xf32> to vector<8xf32>
    %106 = vector.shape_cast %105 : vector<8xf32> to vector<8x1xf32>
    %107 = tpu.reciprocal %106 {approx = true} : vector<8x1xf32> -> vector<8x1xf32>
    %108 = arith.mulf %106, %107 : vector<8x1xf32>
    %cst_40 = arith.constant 2.000000e+00 : f32
    %109 = vector.broadcast %cst_40 : f32 to vector<8x1xf32>
    %110 = arith.subf %109, %108 : vector<8x1xf32>
    %111 = arith.mulf %107, %110 : vector<8x1xf32>
    %112 = vector.broadcast %111 : vector<8x1xf32> to vector<8x8xf32>
    %113 = arith.mulf %104, %112 : vector<8x8xf32>
    %114 = arith.truncf %113 : vector<8x8xf32> to vector<8x8xbf16>
    %cst_41 = arith.constant dense<0.000000e+00> : vector<8x8xf32>
    %115 = tpu.matmul %114, %94, %cst_41 {dimension_numbers = #tpu.dot_dimension_numbers<[1], [0], [0], [1], [0, 0, 1, 1], [], []>} : vector<8x8xbf16>, vector<8x8xbf16>, vector<8x8xf32> -> vector<8x8xf32>
    %c0_42 = arith.constant 0 : index
    %c24 = arith.constant 24 : index
    %116 = vector.load %arg17[%c0_42, %c24] : memref<16x32xf32, #tpu.memory_space<vmem>>, vector<8x8xf32>
    tpu.vector_store %arg17[%c0_42, %c24], %115 {strides = array<i32>} : memref<16x32xf32, #tpu.memory_space<vmem>>, vector<8x8xf32>,
    %117 = vector.extract_strided_slice %3 {offsets = [8, 0], sizes = [8, 32], strides = [1, 1]} : vector<16x32xf32> to vector<8x32xf32>
    %118 = vector.extract_strided_slice %3 {offsets = [8, 0], sizes = [8, 32], strides = [1, 1]} : vector<16x32xf32> to vector<8x32xf32>
    %c1 = arith.constant 1 : index
    %c0_43 = arith.constant 0 : index
    %c0_44 = arith.constant 0 : index
    %119 = vector.load %arg3[%c1, %c0_43, %c0_44] : memref<2x8x8xf32, #tpu.memory_space<vmem>>, vector<1x8x8xf32>
    %120 = vector.shape_cast %119 : vector<1x8x8xf32> to vector<8x8xf32>
    %cst_45 = arith.constant 0.000000e+00 : f32
    %121 = vector.broadcast %cst_45 : f32 to vector<8x8xf32>
    %122 = arith.cmpf oeq, %120, %121 : vector<8x8xf32>
    %123 = vector.extract_strided_slice %117 {offsets = [0, 0], sizes = [8, 8], strides = [1, 1]} : vector<8x32xf32> to vector<8x8xf32>
    %124 = arith.truncf %123 : vector<8x8xf32> to vector<8x8xbf16>
    %125 = vector.extract_strided_slice %118 {offsets = [0, 0], sizes = [8, 8], strides = [1, 1]} : vector<8x32xf32> to vector<8x8xf32>
    %126 = arith.truncf %125 : vector<8x8xf32> to vector<8x8xbf16>
    %cst_46 = arith.constant dense<0.000000e+00> : vector<8x8xf32>
    %127 = tpu.matmul %124, %126, %cst_46 {dimension_numbers = #tpu.dot_dimension_numbers<[1], [1], [0], [0], [0, 0, 1, 0], [], []>} : vector<8x8xbf16>, vector<8x8xbf16>, vector<8x8xf32> -> vector<8x8xf32>
    %cst_47 = arith.constant -1.000000e+20 : f32
    %128 = vector.broadcast %cst_47 : f32 to vector<8x8xf32>
    %129 = arith.select %122, %128, %127 : vector<8x8xi1>, vector<8x8xf32>
    %cst_48 = arith.constant 5.65685415 : f32
    %130 = vector.broadcast %cst_48 : f32 to vector<8x8xf32>
    %131 = arith.mulf %129, %130 : vector<8x8xf32>
    %cst_49 = arith.constant dense<0xFF800000> : vector<8xf32>
    %132 = vector.multi_reduction <maximumf>, %131, %cst_49 [1] : vector<8x8xf32> to vector<8xf32>
    %133 = vector.shape_cast %132 : vector<8xf32> to vector<8x1xf32>
    %134 = vector.broadcast %133 : vector<8x1xf32> to vector<8x8xf32>
    %135 = arith.subf %131, %134 : vector<8x8xf32>
    %136 = math.exp %135 : vector<8x8xf32>
    %cst_50 = arith.constant dense<0.000000e+00> : vector<8xf32>
    %137 = vector.multi_reduction <add>, %136, %cst_50 [1] : vector<8x8xf32> to vector<8xf32>
    %138 = vector.shape_cast %137 : vector<8xf32> to vector<8x1xf32>
    %139 = tpu.reciprocal %138 {approx = true} : vector<8x1xf32> -> vector<8x1xf32>
    %140 = arith.mulf %138, %139 : vector<8x1xf32>
    %cst_51 = arith.constant 2.000000e+00 : f32
    %141 = vector.broadcast %cst_51 : f32 to vector<8x1xf32>
    %142 = arith.subf %141, %140 : vector<8x1xf32>
    %143 = arith.mulf %139, %142 : vector<8x1xf32>
    %144 = vector.broadcast %143 : vector<8x1xf32> to vector<8x8xf32>
    %145 = arith.mulf %136, %144 : vector<8x8xf32>
    %146 = arith.truncf %145 : vector<8x8xf32> to vector<8x8xbf16>
    %cst_52 = arith.constant dense<0.000000e+00> : vector<8x8xf32>
    %147 = tpu.matmul %146, %126, %cst_52 {dimension_numbers = #tpu.dot_dimension_numbers<[1], [0], [0], [1], [0, 0, 1, 1], [], []>} : vector<8x8xbf16>, vector<8x8xbf16>, vector<8x8xf32> -> vector<8x8xf32>
    %c8_53 = arith.constant 8 : index
    %c0_54 = arith.constant 0 : index
    %148 = vector.load %arg17[%c8_53, %c0_54] : memref<16x32xf32, #tpu.memory_space<vmem>>, vector<8x8xf32>
    tpu.vector_store %arg17[%c8_53, %c0_54], %147 {strides = array<i32>} : memref<16x32xf32, #tpu.memory_space<vmem>>, vector<8x8xf32>,
    %149 = vector.extract_strided_slice %117 {offsets = [0, 8], sizes = [8, 8], strides = [1, 1]} : vector<8x32xf32> to vector<8x8xf32>
    %150 = arith.truncf %149 : vector<8x8xf32> to vector<8x8xbf16>
    %151 = vector.extract_strided_slice %118 {offsets = [0, 8], sizes = [8, 8], strides = [1, 1]} : vector<8x32xf32> to vector<8x8xf32>
    %152 = arith.truncf %151 : vector<8x8xf32> to vector<8x8xbf16>
    %cst_55 = arith.constant dense<0.000000e+00> : vector<8x8xf32>
    %153 = tpu.matmul %150, %152, %cst_55 {dimension_numbers = #tpu.dot_dimension_numbers<[1], [1], [0], [0], [0, 0, 1, 0], [], []>} : vector<8x8xbf16>, vector<8x8xbf16>, vector<8x8xf32> -> vector<8x8xf32>
    %cst_56 = arith.constant -1.000000e+20 : f32
    %154 = vector.broadcast %cst_56 : f32 to vector<8x8xf32>
    %155 = arith.select %122, %154, %153 : vector<8x8xi1>, vector<8x8xf32>
    %cst_57 = arith.constant 5.65685415 : f32
    %156 = vector.broadcast %cst_57 : f32 to vector<8x8xf32>
    %157 = arith.mulf %155, %156 : vector<8x8xf32>
    %cst_58 = arith.constant dense<0xFF800000> : vector<8xf32>
    %158 = vector.multi_reduction <maximumf>, %157, %cst_58 [1] : vector<8x8xf32> to vector<8xf32>
    %159 = vector.shape_cast %158 : vector<8xf32> to vector<8x1xf32>
    %160 = vector.broadcast %159 : vector<8x1xf32> to vector<8x8xf32>
    %161 = arith.subf %157, %160 : vector<8x8xf32>
    %162 = math.exp %161 : vector<8x8xf32>
    %cst_59 = arith.constant dense<0.000000e+00> : vector<8xf32>
    %163 = vector.multi_reduction <add>, %162, %cst_59 [1] : vector<8x8xf32> to vector<8xf32>
    %164 = vector.shape_cast %163 : vector<8xf32> to vector<8x1xf32>
    %165 = tpu.reciprocal %164 {approx = true} : vector<8x1xf32> -> vector<8x1xf32>
    %166 = arith.mulf %164, %165 : vector<8x1xf32>
    %cst_60 = arith.constant 2.000000e+00 : f32
    %167 = vector.broadcast %cst_60 : f32 to vector<8x1xf32>
    %168 = arith.subf %167, %166 : vector<8x1xf32>
    %169 = arith.mulf %165, %168 : vector<8x1xf32>
    %170 = vector.broadcast %169 : vector<8x1xf32> to vector<8x8xf32>
    %171 = arith.mulf %162, %170 : vector<8x8xf32>
    %172 = arith.truncf %171 : vector<8x8xf32> to vector<8x8xbf16>
    %cst_61 = arith.constant dense<0.000000e+00> : vector<8x8xf32>
    %173 = tpu.matmul %172, %152, %cst_61 {dimension_numbers = #tpu.dot_dimension_numbers<[1], [0], [0], [1], [0, 0, 1, 1], [], []>} : vector<8x8xbf16>, vector<8x8xbf16>, vector<8x8xf32> -> vector<8x8xf32>
    %c8_62 = arith.constant 8 : index
    %c8_63 = arith.constant 8 : index
    %174 = vector.load %arg17[%c8_62, %c8_63] : memref<16x32xf32, #tpu.memory_space<vmem>>, vector<8x8xf32>
    tpu.vector_store %arg17[%c8_62, %c8_63], %173 {strides = array<i32>} : memref<16x32xf32, #tpu.memory_space<vmem>>, vector<8x8xf32>,
    %175 = vector.extract_strided_slice %117 {offsets = [0, 16], sizes = [8, 8], strides = [1, 1]} : vector<8x32xf32> to vector<8x8xf32>
    %176 = arith.truncf %175 : vector<8x8xf32> to vector<8x8xbf16>
    %177 = vector.extract_strided_slice %118 {offsets = [0, 16], sizes = [8, 8], strides = [1, 1]} : vector<8x32xf32> to vector<8x8xf32>
    %178 = arith.truncf %177 : vector<8x8xf32> to vector<8x8xbf16>
    %cst_64 = arith.constant dense<0.000000e+00> : vector<8x8xf32>
    %179 = tpu.matmul %176, %178, %cst_64 {dimension_numbers = #tpu.dot_dimension_numbers<[1], [1], [0], [0], [0, 0, 1, 0], [], []>} : vector<8x8xbf16>, vector<8x8xbf16>, vector<8x8xf32> -> vector<8x8xf32>
    %cst_65 = arith.constant -1.000000e+20 : f32
    %180 = vector.broadcast %cst_65 : f32 to vector<8x8xf32>
    %181 = arith.select %122, %180, %179 : vector<8x8xi1>, vector<8x8xf32>
    %cst_66 = arith.constant 5.65685415 : f32
    %182 = vector.broadcast %cst_66 : f32 to vector<8x8xf32>
    %183 = arith.mulf %181, %182 : vector<8x8xf32>
    %cst_67 = arith.constant dense<0xFF800000> : vector<8xf32>
    %184 = vector.multi_reduction <maximumf>, %183, %cst_67 [1] : vector<8x8xf32> to vector<8xf32>
    %185 = vector.shape_cast %184 : vector<8xf32> to vector<8x1xf32>
    %186 = vector.broadcast %185 : vector<8x1xf32> to vector<8x8xf32>
    %187 = arith.subf %183, %186 : vector<8x8xf32>
    %188 = math.exp %187 : vector<8x8xf32>
    %cst_68 = arith.constant dense<0.000000e+00> : vector<8xf32>
    %189 = vector.multi_reduction <add>, %188, %cst_68 [1] : vector<8x8xf32> to vector<8xf32>
    %190 = vector.shape_cast %189 : vector<8xf32> to vector<8x1xf32>
    %191 = tpu.reciprocal %190 {approx = true} : vector<8x1xf32> -> vector<8x1xf32>
    %192 = arith.mulf %190, %191 : vector<8x1xf32>
    %cst_69 = arith.constant 2.000000e+00 : f32
    %193 = vector.broadcast %cst_69 : f32 to vector<8x1xf32>
    %194 = arith.subf %193, %192 : vector<8x1xf32>
    %195 = arith.mulf %191, %194 : vector<8x1xf32>
    %196 = vector.broadcast %195 : vector<8x1xf32> to vector<8x8xf32>
    %197 = arith.mulf %188, %196 : vector<8x8xf32>
    %198 = arith.truncf %197 : vector<8x8xf32> to vector<8x8xbf16>
    %cst_70 = arith.constant dense<0.000000e+00> : vector<8x8xf32>
    %199 = tpu.matmul %198, %178, %cst_70 {dimension_numbers = #tpu.dot_dimension_numbers<[1], [0], [0], [1], [0, 0, 1, 1], [], []>} : vector<8x8xbf16>, vector<8x8xbf16>, vector<8x8xf32> -> vector<8x8xf32>
    %c8_71 = arith.constant 8 : index
    %c16_72 = arith.constant 16 : index
    %200 = vector.load %arg17[%c8_71, %c16_72] : memref<16x32xf32, #tpu.memory_space<vmem>>, vector<8x8xf32>
    tpu.vector_store %arg17[%c8_71, %c16_72], %199 {strides = array<i32>} : memref<16x32xf32, #tpu.memory_space<vmem>>, vector<8x8xf32>,
    %201 = vector.extract_strided_slice %117 {offsets = [0, 24], sizes = [8, 8], strides = [1, 1]} : vector<8x32xf32> to vector<8x8xf32>
    %202 = arith.truncf %201 : vector<8x8xf32> to vector<8x8xbf16>
    %203 = vector.extract_strided_slice %118 {offsets = [0, 24], sizes = [8, 8], strides = [1, 1]} : vector<8x32xf32> to vector<8x8xf32>
    %204 = arith.truncf %203 : vector<8x8xf32> to vector<8x8xbf16>
    %cst_73 = arith.constant dense<0.000000e+00> : vector<8x8xf32>
    %205 = tpu.matmul %202, %204, %cst_73 {dimension_numbers = #tpu.dot_dimension_numbers<[1], [1], [0], [0], [0, 0, 1, 0], [], []>} : vector<8x8xbf16>, vector<8x8xbf16>, vector<8x8xf32> -> vector<8x8xf32>
    %cst_74 = arith.constant -1.000000e+20 : f32
    %206 = vector.broadcast %cst_74 : f32 to vector<8x8xf32>
    %207 = arith.select %122, %206, %205 : vector<8x8xi1>, vector<8x8xf32>
    %cst_75 = arith.constant 5.65685415 : f32
    %208 = vector.broadcast %cst_75 : f32 to vector<8x8xf32>
    %209 = arith.mulf %207, %208 : vector<8x8xf32>
    %cst_76 = arith.constant dense<0xFF800000> : vector<8xf32>
    %210 = vector.multi_reduction <maximumf>, %209, %cst_76 [1] : vector<8x8xf32> to vector<8xf32>
    %211 = vector.shape_cast %210 : vector<8xf32> to vector<8x1xf32>
    %212 = vector.broadcast %211 : vector<8x1xf32> to vector<8x8xf32>
    %213 = arith.subf %209, %212 : vector<8x8xf32>
    %214 = math.exp %213 : vector<8x8xf32>
    %cst_77 = arith.constant dense<0.000000e+00> : vector<8xf32>
    %215 = vector.multi_reduction <add>, %214, %cst_77 [1] : vector<8x8xf32> to vector<8xf32>
    %216 = vector.shape_cast %215 : vector<8xf32> to vector<8x1xf32>
    %217 = tpu.reciprocal %216 {approx = true} : vector<8x1xf32> -> vector<8x1xf32>
    %218 = arith.mulf %216, %217 : vector<8x1xf32>
    %cst_78 = arith.constant 2.000000e+00 : f32
    %219 = vector.broadcast %cst_78 : f32 to vector<8x1xf32>
    %220 = arith.subf %219, %218 : vector<8x1xf32>
    %221 = arith.mulf %217, %220 : vector<8x1xf32>
    %222 = vector.broadcast %221 : vector<8x1xf32> to vector<8x8xf32>
    %223 = arith.mulf %214, %222 : vector<8x8xf32>
    %224 = arith.truncf %223 : vector<8x8xf32> to vector<8x8xbf16>
    %cst_79 = arith.constant dense<0.000000e+00> : vector<8x8xf32>
    %225 = tpu.matmul %224, %204, %cst_79 {dimension_numbers = #tpu.dot_dimension_numbers<[1], [0], [0], [1], [0, 0, 1, 1], [], []>} : vector<8x8xbf16>, vector<8x8xbf16>, vector<8x8xf32> -> vector<8x8xf32>
    %c8_80 = arith.constant 8 : index
    %c24_81 = arith.constant 24 : index
    %226 = vector.load %arg17[%c8_80, %c24_81] : memref<16x32xf32, #tpu.memory_space<vmem>>, vector<8x8xf32>
    tpu.vector_store %arg17[%c8_80, %c24_81], %225 {strides = array<i32>} : memref<16x32xf32, #tpu.memory_space<vmem>>, vector<8x8xf32>,
    %c0_82 = arith.constant 0 : index
    %c0_83 = arith.constant 0 : index
    %227 = vector.load %arg17[%c0_82, %c0_83] : memref<16x32xf32, #tpu.memory_space<vmem>>, vector<16x32xf32>
    %228 = arith.truncf %227 : vector<16x32xf32> to vector<16x32xbf16>
    %cst_84 = arith.constant dense<0.000000e+00> : vector<16x32xf32>
    %229 = tpu.matmul %228, %6, %cst_84 {dimension_numbers = #tpu.dot_dimension_numbers<[1], [0], [0], [1], [0, 0, 1, 1], [], []>} : vector<16x32xbf16>, vector<32x32xbf16>, vector<16x32xf32> -> vector<16x32xf32>
    %230 = arith.addf %3, %229 : vector<16x32xf32>
    %c0_85 = arith.constant 0 : index
    %c0_86 = arith.constant 0 : index
    %c0_87 = arith.constant 0 : index
    %231 = vector.load %arg5[%c0_85, %c0_86, %c0_87] : memref<1x1x32xf32, #tpu.memory_space<vmem>>, vector<1x1x32xf32>
    %232 = vector.shape_cast %231 : vector<1x1x32xf32> to vector<1x32xf32>
    %c0_88 = arith.constant 0 : index
    %c0_89 = arith.constant 0 : index
    %c0_90 = arith.constant 0 : index
    %233 = vector.load %arg6[%c0_88, %c0_89, %c0_90] : memref<1x1x32xf32, #tpu.memory_space<vmem>>, vector<1x1x32xf32>
    %234 = vector.shape_cast %233 : vector<1x1x32xf32> to vector<1x32xf32>
    %cst_91 = arith.constant dense<0.000000e+00> : vector<16xf32>
    %235 = vector.multi_reduction <add>, %230, %cst_91 [1] : vector<16x32xf32> to vector<16xf32>
    %236 = vector.shape_cast %235 : vector<16xf32> to vector<16x1xf32>
    %cst_92 = arith.constant 3.200000e+01 : f32
    %237 = vector.broadcast %cst_92 : f32 to vector<16x1xf32>
    %238 = arith.divf %236, %237 : vector<16x1xf32>
    %239 = vector.broadcast %238 : vector<16x1xf32> to vector<16x32xf32>
    %240 = arith.subf %230, %239 : vector<16x32xf32>
    %241 = arith.mulf %240, %240 : vector<16x32xf32>
    %cst_93 = arith.constant dense<0.000000e+00> : vector<16xf32>
    %242 = vector.multi_reduction <add>, %241, %cst_93 [1] : vector<16x32xf32> to vector<16xf32>
    %243 = vector.shape_cast %242 : vector<16xf32> to vector<16x1xf32>
    %cst_94 = arith.constant 3.200000e+01 : f32
    %244 = vector.broadcast %cst_94 : f32 to vector<16x1xf32>
    %245 = arith.divf %243, %244 : vector<16x1xf32>
    %cst_95 = arith.constant 9.99999974E-6 : f32
    %246 = vector.broadcast %cst_95 : f32 to vector<16x1xf32>
    %247 = arith.addf %245, %246 : vector<16x1xf32>
    %248 = math.rsqrt %247 : vector<16x1xf32>
    %249 = vector.broadcast %248 : vector<16x1xf32> to vector<16x32xf32>
    %250 = arith.mulf %240, %249 : vector<16x32xf32>
    %251 = vector.broadcast %232 : vector<1x32xf32> to vector<16x32xf32>
    %252 = arith.mulf %250, %251 : vector<16x32xf32>
    %253 = vector.broadcast %234 : vector<1x32xf32> to vector<16x32xf32>
    %254 = arith.addf %252, %253 : vector<16x32xf32>
    %c0_96 = arith.constant 0 : index
    %c0_97 = arith.constant 0 : index
    %c0_98 = arith.constant 0 : index
    %255 = vector.load %arg7[%c0_96, %c0_97, %c0_98] : memref<1x32x32xbf16, #tpu.memory_space<vmem>>, vector<1x32x32xbf16>
    %256 = vector.shape_cast %255 : vector<1x32x32xbf16> to vector<32x32xbf16>
    %257 = vector.extract_strided_slice %254 {offsets = [0, 0], sizes = [8, 32], strides = [1, 1]} : vector<16x32xf32> to vector<8x32xf32>
    %258 = vector.extract_strided_slice %4 {offsets = [0, 0], sizes = [8, 32], strides = [1, 1]} : vector<16x32xbf16> to vector<8x32xbf16>
    %259 = vector.extract_strided_slice %257 {offsets = [0, 0], sizes = [8, 8], strides = [1, 1]} : vector<8x32xf32> to vector<8x8xf32>
    %260 = arith.truncf %259 : vector<8x8xf32> to vector<8x8xbf16>
    %261 = vector.extract_strided_slice %258 {offsets = [0, 0], sizes = [8, 8], strides = [1, 1]} : vector<8x32xbf16> to vector<8x8xbf16>
    %cst_99 = arith.constant dense<0.000000e+00> : vector<8x8xf32>
    %262 = tpu.matmul %260, %261, %cst_99 {dimension_numbers = #tpu.dot_dimension_numbers<[1], [1], [0], [0], [0, 0, 1, 0], [], []>} : vector<8x8xbf16>, vector<8x8xbf16>, vector<8x8xf32> -> vector<8x8xf32>
    %cst_100 = arith.constant 5.65685415 : f32
    %263 = vector.broadcast %cst_100 : f32 to vector<8x8xf32>
    %264 = arith.mulf %262, %263 : vector<8x8xf32>
    %cst_101 = arith.constant dense<0xFF800000> : vector<8xf32>
    %265 = vector.multi_reduction <maximumf>, %264, %cst_101 [1] : vector<8x8xf32> to vector<8xf32>
    %266 = vector.shape_cast %265 : vector<8xf32> to vector<8x1xf32>
    %267 = vector.broadcast %266 : vector<8x1xf32> to vector<8x8xf32>
    %268 = arith.subf %264, %267 : vector<8x8xf32>
    %269 = math.exp %268 : vector<8x8xf32>
    %cst_102 = arith.constant dense<0.000000e+00> : vector<8xf32>
    %270 = vector.multi_reduction <add>, %269, %cst_102 [1] : vector<8x8xf32> to vector<8xf32>
    %271 = vector.shape_cast %270 : vector<8xf32> to vector<8x1xf32>
    %272 = tpu.reciprocal %271 {approx = true} : vector<8x1xf32> -> vector<8x1xf32>
    %273 = arith.mulf %271, %272 : vector<8x1xf32>
    %cst_103 = arith.constant 2.000000e+00 : f32
    %274 = vector.broadcast %cst_103 : f32 to vector<8x1xf32>
    %275 = arith.subf %274, %273 : vector<8x1xf32>
    %276 = arith.mulf %272, %275 : vector<8x1xf32>
    %277 = vector.broadcast %276 : vector<8x1xf32> to vector<8x8xf32>
    %278 = arith.mulf %269, %277 : vector<8x8xf32>
    %279 = arith.truncf %278 : vector<8x8xf32> to vector<8x8xbf16>
    %cst_104 = arith.constant dense<0.000000e+00> : vector<8x8xf32>
    %280 = tpu.matmul %279, %261, %cst_104 {dimension_numbers = #tpu.dot_dimension_numbers<[1], [0], [0], [1], [0, 0, 1, 1], [], []>} : vector<8x8xbf16>, vector<8x8xbf16>, vector<8x8xf32> -> vector<8x8xf32>
    %c0_105 = arith.constant 0 : index
    %c0_106 = arith.constant 0 : index
    %281 = vector.load %arg17[%c0_105, %c0_106] : memref<16x32xf32, #tpu.memory_space<vmem>>, vector<8x8xf32>
    tpu.vector_store %arg17[%c0_105, %c0_106], %280 {strides = array<i32>} : memref<16x32xf32, #tpu.memory_space<vmem>>, vector<8x8xf32>,
    %282 = vector.extract_strided_slice %257 {offsets = [0, 8], sizes = [8, 8], strides = [1, 1]} : vector<8x32xf32> to vector<8x8xf32>
    %283 = arith.truncf %282 : vector<8x8xf32> to vector<8x8xbf16>
    %284 = vector.extract_strided_slice %258 {offsets = [0, 8], sizes = [8, 8], strides = [1, 1]} : vector<8x32xbf16> to vector<8x8xbf16>
    %cst_107 = arith.constant dense<0.000000e+00> : vector<8x8xf32>
    %285 = tpu.matmul %283, %284, %cst_107 {dimension_numbers = #tpu.dot_dimension_numbers<[1], [1], [0], [0], [0, 0, 1, 0], [], []>} : vector<8x8xbf16>, vector<8x8xbf16>, vector<8x8xf32> -> vector<8x8xf32>
    %cst_108 = arith.constant 5.65685415 : f32
    %286 = vector.broadcast %cst_108 : f32 to vector<8x8xf32>
    %287 = arith.mulf %285, %286 : vector<8x8xf32>
    %cst_109 = arith.constant dense<0xFF800000> : vector<8xf32>
    %288 = vector.multi_reduction <maximumf>, %287, %cst_109 [1] : vector<8x8xf32> to vector<8xf32>
    %289 = vector.shape_cast %288 : vector<8xf32> to vector<8x1xf32>
    %290 = vector.broadcast %289 : vector<8x1xf32> to vector<8x8xf32>
    %291 = arith.subf %287, %290 : vector<8x8xf32>
    %292 = math.exp %291 : vector<8x8xf32>
    %cst_110 = arith.constant dense<0.000000e+00> : vector<8xf32>
    %293 = vector.multi_reduction <add>, %292, %cst_110 [1] : vector<8x8xf32> to vector<8xf32>
    %294 = vector.shape_cast %293 : vector<8xf32> to vector<8x1xf32>
    %295 = tpu.reciprocal %294 {approx = true} : vector<8x1xf32> -> vector<8x1xf32>
    %296 = arith.mulf %294, %295 : vector<8x1xf32>
    %cst_111 = arith.constant 2.000000e+00 : f32
    %297 = vector.broadcast %cst_111 : f32 to vector<8x1xf32>
    %298 = arith.subf %297, %296 : vector<8x1xf32>
    %299 = arith.mulf %295, %298 : vector<8x1xf32>
    %300 = vector.broadcast %299 : vector<8x1xf32> to vector<8x8xf32>
    %301 = arith.mulf %292, %300 : vector<8x8xf32>
    %302 = arith.truncf %301 : vector<8x8xf32> to vector<8x8xbf16>
    %cst_112 = arith.constant dense<0.000000e+00> : vector<8x8xf32>
    %303 = tpu.matmul %302, %284, %cst_112 {dimension_numbers = #tpu.dot_dimension_numbers<[1], [0], [0], [1], [0, 0, 1, 1], [], []>} : vector<8x8xbf16>, vector<8x8xbf16>, vector<8x8xf32> -> vector<8x8xf32>
    %c0_113 = arith.constant 0 : index
    %c8_114 = arith.constant 8 : index
    %304 = vector.load %arg17[%c0_113, %c8_114] : memref<16x32xf32, #tpu.memory_space<vmem>>, vector<8x8xf32>
    tpu.vector_store %arg17[%c0_113, %c8_114], %303 {strides = array<i32>} : memref<16x32xf32, #tpu.memory_space<vmem>>, vector<8x8xf32>,
    %305 = vector.extract_strided_slice %257 {offsets = [0, 16], sizes = [8, 8], strides = [1, 1]} : vector<8x32xf32> to vector<8x8xf32>
    %306 = arith.truncf %305 : vector<8x8xf32> to vector<8x8xbf16>
    %307 = vector.extract_strided_slice %258 {offsets = [0, 16], sizes = [8, 8], strides = [1, 1]} : vector<8x32xbf16> to vector<8x8xbf16>
    %cst_115 = arith.constant dense<0.000000e+00> : vector<8x8xf32>
    %308 = tpu.matmul %306, %307, %cst_115 {dimension_numbers = #tpu.dot_dimension_numbers<[1], [1], [0], [0], [0, 0, 1, 0], [], []>} : vector<8x8xbf16>, vector<8x8xbf16>, vector<8x8xf32> -> vector<8x8xf32>
    %cst_116 = arith.constant 5.65685415 : f32
    %309 = vector.broadcast %cst_116 : f32 to vector<8x8xf32>
    %310 = arith.mulf %308, %309 : vector<8x8xf32>
    %cst_117 = arith.constant dense<0xFF800000> : vector<8xf32>
    %311 = vector.multi_reduction <maximumf>, %310, %cst_117 [1] : vector<8x8xf32> to vector<8xf32>
    %312 = vector.shape_cast %311 : vector<8xf32> to vector<8x1xf32>
    %313 = vector.broadcast %312 : vector<8x1xf32> to vector<8x8xf32>
    %314 = arith.subf %310, %313 : vector<8x8xf32>
    %315 = math.exp %314 : vector<8x8xf32>
    %cst_118 = arith.constant dense<0.000000e+00> : vector<8xf32>
    %316 = vector.multi_reduction <add>, %315, %cst_118 [1] : vector<8x8xf32> to vector<8xf32>
    %317 = vector.shape_cast %316 : vector<8xf32> to vector<8x1xf32>
    %318 = tpu.reciprocal %317 {approx = true} : vector<8x1xf32> -> vector<8x1xf32>
    %319 = arith.mulf %317, %318 : vector<8x1xf32>
    %cst_119 = arith.constant 2.000000e+00 : f32
    %320 = vector.broadcast %cst_119 : f32 to vector<8x1xf32>
    %321 = arith.subf %320, %319 : vector<8x1xf32>
    %322 = arith.mulf %318, %321 : vector<8x1xf32>
    %323 = vector.broadcast %322 : vector<8x1xf32> to vector<8x8xf32>
    %324 = arith.mulf %315, %323 : vector<8x8xf32>
    %325 = arith.truncf %324 : vector<8x8xf32> to vector<8x8xbf16>
    %cst_120 = arith.constant dense<0.000000e+00> : vector<8x8xf32>
    %326 = tpu.matmul %325, %307, %cst_120 {dimension_numbers = #tpu.dot_dimension_numbers<[1], [0], [0], [1], [0, 0, 1, 1], [], []>} : vector<8x8xbf16>, vector<8x8xbf16>, vector<8x8xf32> -> vector<8x8xf32>
    %c0_121 = arith.constant 0 : index
    %c16_122 = arith.constant 16 : index
    %327 = vector.load %arg17[%c0_121, %c16_122] : memref<16x32xf32, #tpu.memory_space<vmem>>, vector<8x8xf32>
    tpu.vector_store %arg17[%c0_121, %c16_122], %326 {strides = array<i32>} : memref<16x32xf32, #tpu.memory_space<vmem>>, vector<8x8xf32>,
    %328 = vector.extract_strided_slice %257 {offsets = [0, 24], sizes = [8, 8], strides = [1, 1]} : vector<8x32xf32> to vector<8x8xf32>
    %329 = arith.truncf %328 : vector<8x8xf32> to vector<8x8xbf16>
    %330 = vector.extract_strided_slice %258 {offsets = [0, 24], sizes = [8, 8], strides = [1, 1]} : vector<8x32xbf16> to vector<8x8xbf16>
    %cst_123 = arith.constant dense<0.000000e+00> : vector<8x8xf32>
    %331 = tpu.matmul %329, %330, %cst_123 {dimension_numbers = #tpu.dot_dimension_numbers<[1], [1], [0], [0], [0, 0, 1, 0], [], []>} : vector<8x8xbf16>, vector<8x8xbf16>, vector<8x8xf32> -> vector<8x8xf32>
    %cst_124 = arith.constant 5.65685415 : f32
    %332 = vector.broadcast %cst_124 : f32 to vector<8x8xf32>
    %333 = arith.mulf %331, %332 : vector<8x8xf32>
    %cst_125 = arith.constant dense<0xFF800000> : vector<8xf32>
    %334 = vector.multi_reduction <maximumf>, %333, %cst_125 [1] : vector<8x8xf32> to vector<8xf32>
    %335 = vector.shape_cast %334 : vector<8xf32> to vector<8x1xf32>
    %336 = vector.broadcast %335 : vector<8x1xf32> to vector<8x8xf32>
    %337 = arith.subf %333, %336 : vector<8x8xf32>
    %338 = math.exp %337 : vector<8x8xf32>
    %cst_126 = arith.constant dense<0.000000e+00> : vector<8xf32>
    %339 = vector.multi_reduction <add>, %338, %cst_126 [1] : vector<8x8xf32> to vector<8xf32>
    %340 = vector.shape_cast %339 : vector<8xf32> to vector<8x1xf32>
    %341 = tpu.reciprocal %340 {approx = true} : vector<8x1xf32> -> vector<8x1xf32>
    %342 = arith.mulf %340, %341 : vector<8x1xf32>
    %cst_127 = arith.constant 2.000000e+00 : f32
    %343 = vector.broadcast %cst_127 : f32 to vector<8x1xf32>
    %344 = arith.subf %343, %342 : vector<8x1xf32>
    %345 = arith.mulf %341, %344 : vector<8x1xf32>
    %346 = vector.broadcast %345 : vector<8x1xf32> to vector<8x8xf32>
    %347 = arith.mulf %338, %346 : vector<8x8xf32>
    %348 = arith.truncf %347 : vector<8x8xf32> to vector<8x8xbf16>
    %cst_128 = arith.constant dense<0.000000e+00> : vector<8x8xf32>
    %349 = tpu.matmul %348, %330, %cst_128 {dimension_numbers = #tpu.dot_dimension_numbers<[1], [0], [0], [1], [0, 0, 1, 1], [], []>} : vector<8x8xbf16>, vector<8x8xbf16>, vector<8x8xf32> -> vector<8x8xf32>
    %c0_129 = arith.constant 0 : index
    %c24_130 = arith.constant 24 : index
    %350 = vector.load %arg17[%c0_129, %c24_130] : memref<16x32xf32, #tpu.memory_space<vmem>>, vector<8x8xf32>
    tpu.vector_store %arg17[%c0_129, %c24_130], %349 {strides = array<i32>} : memref<16x32xf32, #tpu.memory_space<vmem>>, vector<8x8xf32>,
    %351 = vector.extract_strided_slice %254 {offsets = [8, 0], sizes = [8, 32], strides = [1, 1]} : vector<16x32xf32> to vector<8x32xf32>
    %352 = vector.extract_strided_slice %4 {offsets = [8, 0], sizes = [8, 32], strides = [1, 1]} : vector<16x32xbf16> to vector<8x32xbf16>
    %353 = vector.extract_strided_slice %351 {offsets = [0, 0], sizes = [8, 8], strides = [1, 1]} : vector<8x32xf32> to vector<8x8xf32>
    %354 = arith.truncf %353 : vector<8x8xf32> to vector<8x8xbf16>
    %355 = vector.extract_strided_slice %352 {offsets = [0, 0], sizes = [8, 8], strides = [1, 1]} : vector<8x32xbf16> to vector<8x8xbf16>
    %cst_131 = arith.constant dense<0.000000e+00> : vector<8x8xf32>
    %356 = tpu.matmul %354, %355, %cst_131 {dimension_numbers = #tpu.dot_dimension_numbers<[1], [1], [0], [0], [0, 0, 1, 0], [], []>} : vector<8x8xbf16>, vector<8x8xbf16>, vector<8x8xf32> -> vector<8x8xf32>
    %cst_132 = arith.constant 5.65685415 : f32
    %357 = vector.broadcast %cst_132 : f32 to vector<8x8xf32>
    %358 = arith.mulf %356, %357 : vector<8x8xf32>
    %cst_133 = arith.constant dense<0xFF800000> : vector<8xf32>
    %359 = vector.multi_reduction <maximumf>, %358, %cst_133 [1] : vector<8x8xf32> to vector<8xf32>
    %360 = vector.shape_cast %359 : vector<8xf32> to vector<8x1xf32>
    %361 = vector.broadcast %360 : vector<8x1xf32> to vector<8x8xf32>
    %362 = arith.subf %358, %361 : vector<8x8xf32>
    %363 = math.exp %362 : vector<8x8xf32>
    %cst_134 = arith.constant dense<0.000000e+00> : vector<8xf32>
    %364 = vector.multi_reduction <add>, %363, %cst_134 [1] : vector<8x8xf32> to vector<8xf32>
    %365 = vector.shape_cast %364 : vector<8xf32> to vector<8x1xf32>
    %366 = tpu.reciprocal %365 {approx = true} : vector<8x1xf32> -> vector<8x1xf32>
    %367 = arith.mulf %365, %366 : vector<8x1xf32>
    %cst_135 = arith.constant 2.000000e+00 : f32
    %368 = vector.broadcast %cst_135 : f32 to vector<8x1xf32>
    %369 = arith.subf %368, %367 : vector<8x1xf32>
    %370 = arith.mulf %366, %369 : vector<8x1xf32>
    %371 = vector.broadcast %370 : vector<8x1xf32> to vector<8x8xf32>
    %372 = arith.mulf %363, %371 : vector<8x8xf32>
    %373 = arith.truncf %372 : vector<8x8xf32> to vector<8x8xbf16>
    %cst_136 = arith.constant dense<0.000000e+00> : vector<8x8xf32>
    %374 = tpu.matmul %373, %355, %cst_136 {dimension_numbers = #tpu.dot_dimension_numbers<[1], [0], [0], [1], [0, 0, 1, 1], [], []>} : vector<8x8xbf16>, vector<8x8xbf16>, vector<8x8xf32> -> vector<8x8xf32>
    %c8_137 = arith.constant 8 : index
    %c0_138 = arith.constant 0 : index
    %375 = vector.load %arg17[%c8_137, %c0_138] : memref<16x32xf32, #tpu.memory_space<vmem>>, vector<8x8xf32>
    tpu.vector_store %arg17[%c8_137, %c0_138], %374 {strides = array<i32>} : memref<16x32xf32, #tpu.memory_space<vmem>>, vector<8x8xf32>,
    %376 = vector.extract_strided_slice %351 {offsets = [0, 8], sizes = [8, 8], strides = [1, 1]} : vector<8x32xf32> to vector<8x8xf32>
    %377 = arith.truncf %376 : vector<8x8xf32> to vector<8x8xbf16>
    %378 = vector.extract_strided_slice %352 {offsets = [0, 8], sizes = [8, 8], strides = [1, 1]} : vector<8x32xbf16> to vector<8x8xbf16>
    %cst_139 = arith.constant dense<0.000000e+00> : vector<8x8xf32>
    %379 = tpu.matmul %377, %378, %cst_139 {dimension_numbers = #tpu.dot_dimension_numbers<[1], [1], [0], [0], [0, 0, 1, 0], [], []>} : vector<8x8xbf16>, vector<8x8xbf16>, vector<8x8xf32> -> vector<8x8xf32>
    %cst_140 = arith.constant 5.65685415 : f32
    %380 = vector.broadcast %cst_140 : f32 to vector<8x8xf32>
    %381 = arith.mulf %379, %380 : vector<8x8xf32>
    %cst_141 = arith.constant dense<0xFF800000> : vector<8xf32>
    %382 = vector.multi_reduction <maximumf>, %381, %cst_141 [1] : vector<8x8xf32> to vector<8xf32>
    %383 = vector.shape_cast %382 : vector<8xf32> to vector<8x1xf32>
    %384 = vector.broadcast %383 : vector<8x1xf32> to vector<8x8xf32>
    %385 = arith.subf %381, %384 : vector<8x8xf32>
    %386 = math.exp %385 : vector<8x8xf32>
    %cst_142 = arith.constant dense<0.000000e+00> : vector<8xf32>
    %387 = vector.multi_reduction <add>, %386, %cst_142 [1] : vector<8x8xf32> to vector<8xf32>
    %388 = vector.shape_cast %387 : vector<8xf32> to vector<8x1xf32>
    %389 = tpu.reciprocal %388 {approx = true} : vector<8x1xf32> -> vector<8x1xf32>
    %390 = arith.mulf %388, %389 : vector<8x1xf32>
    %cst_143 = arith.constant 2.000000e+00 : f32
    %391 = vector.broadcast %cst_143 : f32 to vector<8x1xf32>
    %392 = arith.subf %391, %390 : vector<8x1xf32>
    %393 = arith.mulf %389, %392 : vector<8x1xf32>
    %394 = vector.broadcast %393 : vector<8x1xf32> to vector<8x8xf32>
    %395 = arith.mulf %386, %394 : vector<8x8xf32>
    %396 = arith.truncf %395 : vector<8x8xf32> to vector<8x8xbf16>
    %cst_144 = arith.constant dense<0.000000e+00> : vector<8x8xf32>
    %397 = tpu.matmul %396, %378, %cst_144 {dimension_numbers = #tpu.dot_dimension_numbers<[1], [0], [0], [1], [0, 0, 1, 1], [], []>} : vector<8x8xbf16>, vector<8x8xbf16>, vector<8x8xf32> -> vector<8x8xf32>
    %c8_145 = arith.constant 8 : index
    %c8_146 = arith.constant 8 : index
    %398 = vector.load %arg17[%c8_145, %c8_146] : memref<16x32xf32, #tpu.memory_space<vmem>>, vector<8x8xf32>
    tpu.vector_store %arg17[%c8_145, %c8_146], %397 {strides = array<i32>} : memref<16x32xf32, #tpu.memory_space<vmem>>, vector<8x8xf32>,
    %399 = vector.extract_strided_slice %351 {offsets = [0, 16], sizes = [8, 8], strides = [1, 1]} : vector<8x32xf32> to vector<8x8xf32>
    %400 = arith.truncf %399 : vector<8x8xf32> to vector<8x8xbf16>
    %401 = vector.extract_strided_slice %352 {offsets = [0, 16], sizes = [8, 8], strides = [1, 1]} : vector<8x32xbf16> to vector<8x8xbf16>
    %cst_147 = arith.constant dense<0.000000e+00> : vector<8x8xf32>
    %402 = tpu.matmul %400, %401, %cst_147 {dimension_numbers = #tpu.dot_dimension_numbers<[1], [1], [0], [0], [0, 0, 1, 0], [], []>} : vector<8x8xbf16>, vector<8x8xbf16>, vector<8x8xf32> -> vector<8x8xf32>
    %cst_148 = arith.constant 5.65685415 : f32
    %403 = vector.broadcast %cst_148 : f32 to vector<8x8xf32>
    %404 = arith.mulf %402, %403 : vector<8x8xf32>
    %cst_149 = arith.constant dense<0xFF800000> : vector<8xf32>
    %405 = vector.multi_reduction <maximumf>, %404, %cst_149 [1] : vector<8x8xf32> to vector<8xf32>
    %406 = vector.shape_cast %405 : vector<8xf32> to vector<8x1xf32>
    %407 = vector.broadcast %406 : vector<8x1xf32> to vector<8x8xf32>
    %408 = arith.subf %404, %407 : vector<8x8xf32>
    %409 = math.exp %408 : vector<8x8xf32>
    %cst_150 = arith.constant dense<0.000000e+00> : vector<8xf32>
    %410 = vector.multi_reduction <add>, %409, %cst_150 [1] : vector<8x8xf32> to vector<8xf32>
    %411 = vector.shape_cast %410 : vector<8xf32> to vector<8x1xf32>
    %412 = tpu.reciprocal %411 {approx = true} : vector<8x1xf32> -> vector<8x1xf32>
    %413 = arith.mulf %411, %412 : vector<8x1xf32>
    %cst_151 = arith.constant 2.000000e+00 : f32
    %414 = vector.broadcast %cst_151 : f32 to vector<8x1xf32>
    %415 = arith.subf %414, %413 : vector<8x1xf32>
    %416 = arith.mulf %412, %415 : vector<8x1xf32>
    %417 = vector.broadcast %416 : vector<8x1xf32> to vector<8x8xf32>
    %418 = arith.mulf %409, %417 : vector<8x8xf32>
    %419 = arith.truncf %418 : vector<8x8xf32> to vector<8x8xbf16>
    %cst_152 = arith.constant dense<0.000000e+00> : vector<8x8xf32>
    %420 = tpu.matmul %419, %401, %cst_152 {dimension_numbers = #tpu.dot_dimension_numbers<[1], [0], [0], [1], [0, 0, 1, 1], [], []>} : vector<8x8xbf16>, vector<8x8xbf16>, vector<8x8xf32> -> vector<8x8xf32>
    %c8_153 = arith.constant 8 : index
    %c16_154 = arith.constant 16 : index
    %421 = vector.load %arg17[%c8_153, %c16_154] : memref<16x32xf32, #tpu.memory_space<vmem>>, vector<8x8xf32>
    tpu.vector_store %arg17[%c8_153, %c16_154], %420 {strides = array<i32>} : memref<16x32xf32, #tpu.memory_space<vmem>>, vector<8x8xf32>,
    %422 = vector.extract_strided_slice %351 {offsets = [0, 24], sizes = [8, 8], strides = [1, 1]} : vector<8x32xf32> to vector<8x8xf32>
    %423 = arith.truncf %422 : vector<8x8xf32> to vector<8x8xbf16>
    %424 = vector.extract_strided_slice %352 {offsets = [0, 24], sizes = [8, 8], strides = [1, 1]} : vector<8x32xbf16> to vector<8x8xbf16>
    %cst_155 = arith.constant dense<0.000000e+00> : vector<8x8xf32>
    %425 = tpu.matmul %423, %424, %cst_155 {dimension_numbers = #tpu.dot_dimension_numbers<[1], [1], [0], [0], [0, 0, 1, 0], [], []>} : vector<8x8xbf16>, vector<8x8xbf16>, vector<8x8xf32> -> vector<8x8xf32>
    %cst_156 = arith.constant 5.65685415 : f32
    %426 = vector.broadcast %cst_156 : f32 to vector<8x8xf32>
    %427 = arith.mulf %425, %426 : vector<8x8xf32>
    %cst_157 = arith.constant dense<0xFF800000> : vector<8xf32>
    %428 = vector.multi_reduction <maximumf>, %427, %cst_157 [1] : vector<8x8xf32> to vector<8xf32>
    %429 = vector.shape_cast %428 : vector<8xf32> to vector<8x1xf32>
    %430 = vector.broadcast %429 : vector<8x1xf32> to vector<8x8xf32>
    %431 = arith.subf %427, %430 : vector<8x8xf32>
    %432 = math.exp %431 : vector<8x8xf32>
    %cst_158 = arith.constant dense<0.000000e+00> : vector<8xf32>
    %433 = vector.multi_reduction <add>, %432, %cst_158 [1] : vector<8x8xf32> to vector<8xf32>
    %434 = vector.shape_cast %433 : vector<8xf32> to vector<8x1xf32>
    %435 = tpu.reciprocal %434 {approx = true} : vector<8x1xf32> -> vector<8x1xf32>
    %436 = arith.mulf %434, %435 : vector<8x1xf32>
    %cst_159 = arith.constant 2.000000e+00 : f32
    %437 = vector.broadcast %cst_159 : f32 to vector<8x1xf32>
    %438 = arith.subf %437, %436 : vector<8x1xf32>
    %439 = arith.mulf %435, %438 : vector<8x1xf32>
    %440 = vector.broadcast %439 : vector<8x1xf32> to vector<8x8xf32>
    %441 = arith.mulf %432, %440 : vector<8x8xf32>
    %442 = arith.truncf %441 : vector<8x8xf32> to vector<8x8xbf16>
    %cst_160 = arith.constant dense<0.000000e+00> : vector<8x8xf32>
    %443 = tpu.matmul %442, %424, %cst_160 {dimension_numbers = #tpu.dot_dimension_numbers<[1], [0], [0], [1], [0, 0, 1, 1], [], []>} : vector<8x8xbf16>, vector<8x8xbf16>, vector<8x8xf32> -> vector<8x8xf32>
    %c8_161 = arith.constant 8 : index
    %c24_162 = arith.constant 24 : index
    %444 = vector.load %arg17[%c8_161, %c24_162] : memref<16x32xf32, #tpu.memory_space<vmem>>, vector<8x8xf32>
    tpu.vector_store %arg17[%c8_161, %c24_162], %443 {strides = array<i32>} : memref<16x32xf32, #tpu.memory_space<vmem>>, vector<8x8xf32>,
    %c0_163 = arith.constant 0 : index
    %c0_164 = arith.constant 0 : index
    %445 = vector.load %arg17[%c0_163, %c0_164] : memref<16x32xf32, #tpu.memory_space<vmem>>, vector<16x32xf32>
    %446 = arith.truncf %445 : vector<16x32xf32> to vector<16x32xbf16>
    %cst_165 = arith.constant dense<0.000000e+00> : vector<16x32xf32>
    %447 = tpu.matmul %446, %256, %cst_165 {dimension_numbers = #tpu.dot_dimension_numbers<[1], [0], [0], [1], [0, 0, 1, 1], [], []>} : vector<16x32xbf16>, vector<32x32xbf16>, vector<16x32xf32> -> vector<16x32xf32>
    %448 = arith.addf %447, %254 : vector<16x32xf32>
    %c0_166 = arith.constant 0 : index
    %c0_167 = arith.constant 0 : index
    %c0_168 = arith.constant 0 : index
    %449 = vector.load %arg8[%c0_166, %c0_167, %c0_168] : memref<1x1x32xf32, #tpu.memory_space<vmem>>, vector<1x1x32xf32>
    %450 = vector.shape_cast %449 : vector<1x1x32xf32> to vector<1x32xf32>
    %c0_169 = arith.constant 0 : index
    %c0_170 = arith.constant 0 : index
    %c0_171 = arith.constant 0 : index
    %451 = vector.load %arg9[%c0_169, %c0_170, %c0_171] : memref<1x1x32xf32, #tpu.memory_space<vmem>>, vector<1x1x32xf32>
    %452 = vector.shape_cast %451 : vector<1x1x32xf32> to vector<1x32xf32>
    %cst_172 = arith.constant dense<0.000000e+00> : vector<16xf32>
    %453 = vector.multi_reduction <add>, %448, %cst_172 [1] : vector<16x32xf32> to vector<16xf32>
    %454 = vector.shape_cast %453 : vector<16xf32> to vector<16x1xf32>
    %cst_173 = arith.constant 3.200000e+01 : f32
    %455 = vector.broadcast %cst_173 : f32 to vector<16x1xf32>
    %456 = arith.divf %454, %455 : vector<16x1xf32>
    %457 = vector.broadcast %456 : vector<16x1xf32> to vector<16x32xf32>
    %458 = arith.subf %448, %457 : vector<16x32xf32>
    %459 = arith.mulf %458, %458 : vector<16x32xf32>
    %cst_174 = arith.constant dense<0.000000e+00> : vector<16xf32>
    %460 = vector.multi_reduction <add>, %459, %cst_174 [1] : vector<16x32xf32> to vector<16xf32>
    %461 = vector.shape_cast %460 : vector<16xf32> to vector<16x1xf32>
    %cst_175 = arith.constant 3.200000e+01 : f32
    %462 = vector.broadcast %cst_175 : f32 to vector<16x1xf32>
    %463 = arith.divf %461, %462 : vector<16x1xf32>
    %cst_176 = arith.constant 9.99999974E-6 : f32
    %464 = vector.broadcast %cst_176 : f32 to vector<16x1xf32>
    %465 = arith.addf %463, %464 : vector<16x1xf32>
    %466 = math.rsqrt %465 : vector<16x1xf32>
    %467 = vector.broadcast %466 : vector<16x1xf32> to vector<16x32xf32>
    %468 = arith.mulf %458, %467 : vector<16x32xf32>
    %469 = vector.broadcast %450 : vector<1x32xf32> to vector<16x32xf32>
    %470 = arith.mulf %468, %469 : vector<16x32xf32>
    %471 = vector.broadcast %452 : vector<1x32xf32> to vector<16x32xf32>
    %472 = arith.addf %470, %471 : vector<16x32xf32>
    %473 = arith.truncf %472 : vector<16x32xf32> to vector<16x32xbf16>
    %c0_177 = arith.constant 0 : index
    %c0_178 = arith.constant 0 : index
    %c0_179 = arith.constant 0 : index
    %474 = vector.load %arg10[%c0_177, %c0_178, %c0_179] : memref<1x32x128xbf16, #tpu.memory_space<vmem>>, vector<1x32x128xbf16>
    %475 = vector.shape_cast %474 : vector<1x32x128xbf16> to vector<32x128xbf16>
    %cst_180 = arith.constant dense<0.000000e+00> : vector<16x128xf32>
    %476 = tpu.matmul %473, %475, %cst_180 {dimension_numbers = #tpu.dot_dimension_numbers<[1], [0], [0], [1], [0, 0, 1, 1], [], []>} : vector<16x32xbf16>, vector<32x128xbf16>, vector<16x128xf32> -> vector<16x128xf32>
    %c0_181 = arith.constant 0 : index
    %c0_182 = arith.constant 0 : index
    %c0_183 = arith.constant 0 : index
    %477 = vector.load %arg11[%c0_181, %c0_182, %c0_183] : memref<1x1x128xf32, #tpu.memory_space<vmem>>, vector<1x1x128xf32>
    %478 = vector.shape_cast %477 : vector<1x1x128xf32> to vector<1x128xf32>
    %479 = vector.broadcast %478 : vector<1x128xf32> to vector<16x128xf32>
    %480 = arith.addf %476, %479 : vector<16x128xf32>
    %cst_184 = arith.constant 0.000000e+00 : f32
    %481 = vector.broadcast %cst_184 : f32 to vector<16x128xf32>
    %482 = arith.maximumf %480, %481 : vector<16x128xf32>
    %483 = arith.truncf %482 : vector<16x128xf32> to vector<16x128xbf16>
    %c0_185 = arith.constant 0 : index
    %c0_186 = arith.constant 0 : index
    %c0_187 = arith.constant 0 : index
    %484 = vector.load %arg12[%c0_185, %c0_186, %c0_187] : memref<1x128x32xbf16, #tpu.memory_space<vmem>>, vector<1x128x32xbf16>
    %485 = vector.shape_cast %484 : vector<1x128x32xbf16> to vector<128x32xbf16>
    %cst_188 = arith.constant dense<0.000000e+00> : vector<16x32xf32>
    %486 = tpu.matmul %483, %485, %cst_188 {dimension_numbers = #tpu.dot_dimension_numbers<[1], [0], [0], [1], [0, 0, 1, 1], [], []>} : vector<16x128xbf16>, vector<128x32xbf16>, vector<16x32xf32> -> vector<16x32xf32>
    %c0_189 = arith.constant 0 : index
    %c0_190 = arith.constant 0 : index
    %c0_191 = arith.constant 0 : index
    %487 = vector.load %arg13[%c0_189, %c0_190, %c0_191] : memref<1x1x32xf32, #tpu.memory_space<vmem>>, vector<1x1x32xf32>
    %488 = vector.shape_cast %487 : vector<1x1x32xf32> to vector<1x32xf32>
    %489 = vector.broadcast %488 : vector<1x32xf32> to vector<16x32xf32>
    %490 = arith.addf %486, %489 : vector<16x32xf32>
    %491 = arith.addf %490, %472 : vector<16x32xf32>
    %c0_192 = arith.constant 0 : index
    %c0_193 = arith.constant 0 : index
    %c0_194 = arith.constant 0 : index
    %492 = vector.load %arg14[%c0_192, %c0_193, %c0_194] : memref<1x1x32xf32, #tpu.memory_space<vmem>>, vector<1x1x32xf32>
    %493 = vector.shape_cast %492 : vector<1x1x32xf32> to vector<1x32xf32>
    %c0_195 = arith.constant 0 : index
    %c0_196 = arith.constant 0 : index
    %c0_197 = arith.constant 0 : index
    %494 = vector.load %arg15[%c0_195, %c0_196, %c0_197] : memref<1x1x32xf32, #tpu.memory_space<vmem>>, vector<1x1x32xf32>
    %495 = vector.shape_cast %494 : vector<1x1x32xf32> to vector<1x32xf32>
    %cst_198 = arith.constant dense<0.000000e+00> : vector<16xf32>
    %496 = vector.multi_reduction <add>, %491, %cst_198 [1] : vector<16x32xf32> to vector<16xf32>
    %497 = vector.shape_cast %496 : vector<16xf32> to vector<16x1xf32>
    %cst_199 = arith.constant 3.200000e+01 : f32
    %498 = vector.broadcast %cst_199 : f32 to vector<16x1xf32>
    %499 = arith.divf %497, %498 : vector<16x1xf32>
    %500 = vector.broadcast %499 : vector<16x1xf32> to vector<16x32xf32>
    %501 = arith.subf %491, %500 : vector<16x32xf32>
    %502 = arith.mulf %501, %501 : vector<16x32xf32>
    %cst_200 = arith.constant dense<0.000000e+00> : vector<16xf32>
    %503 = vector.multi_reduction <add>, %502, %cst_200 [1] : vector<16x32xf32> to vector<16xf32>
    %504 = vector.shape_cast %503 : vector<16xf32> to vector<16x1xf32>
    %cst_201 = arith.constant 3.200000e+01 : f32
    %505 = vector.broadcast %cst_201 : f32 to vector<16x1xf32>
    %506 = arith.divf %504, %505 : vector<16x1xf32>
    %cst_202 = arith.constant 9.99999974E-6 : f32
    %507 = vector.broadcast %cst_202 : f32 to vector<16x1xf32>
    %508 = arith.addf %506, %507 : vector<16x1xf32>
    %509 = math.rsqrt %508 : vector<16x1xf32>
    %510 = vector.broadcast %509 : vector<16x1xf32> to vector<16x32xf32>
    %511 = arith.mulf %501, %510 : vector<16x32xf32>
    %512 = vector.broadcast %493 : vector<1x32xf32> to vector<16x32xf32>
    %513 = arith.mulf %511, %512 : vector<16x32xf32>
    %514 = vector.broadcast %495 : vector<1x32xf32> to vector<16x32xf32>
    %515 = arith.addf %513, %514 : vector<16x32xf32>
    %c0_203 = arith.constant 0 : index
    %c0_204 = arith.constant 0 : index
    %516 = vector.load %arg16[%c0_203, %c0_204] : memref<16x32xf32, #tpu.memory_space<vmem>>, vector<16x32xf32>
    tpu.vector_store %arg16[%c0_203, %c0_204], %515 {strides = array<i32>} : memref<16x32xf32, #tpu.memory_space<vmem>>, vector<16x32xf32>,
    return
  }
  func.func @transform_0(%arg0: i32) -> (i32, i32) {
    %c0_i32 = arith.constant 0 : i32
    %c0_i32_0 = arith.constant 0 : i32
    %c0_i32_1 = arith.constant 0 : i32
    return %c0_i32, %c0_i32_0 : i32, i32
  }
  func.func @transform_1(%arg0: i32) -> (i32, i32) {
    %c0_i32 = arith.constant 0 : i32
    %c0_i32_0 = arith.constant 0 : i32
    %c0_i32_1 = arith.constant 0 : i32
    return %c0_i32, %c0_i32_0 : i32, i32
  }
  func.func @transform_2(%arg0: i32) -> (i32, i32, i32) {
    %c0_i32 = arith.constant 0 : i32
    %c0_i32_0 = arith.constant 0 : i32
    %c0_i32_1 = arith.constant 0 : i32
    %c0_i32_2 = arith.constant 0 : i32
    return %c0_i32, %c0_i32_0, %c0_i32_1 : i32, i32, i32
  }
  func.func @transform_3(%arg0: i32) -> (i32, i32, i32) {
    %c0_i32 = arith.constant 0 : i32
    %c0_i32_0 = arith.constant 0 : i32
    %c0_i32_1 = arith.constant 0 : i32
    return %arg0, %c0_i32, %c0_i32_0 : i32, i32, i32
  }
  func.func @transform_4(%arg0: i32) -> (i32, i32, i32) {
    %c0_i32 = arith.constant 0 : i32
    %c0_i32_0 = arith.constant 0 : i32
    %c0_i32_1 = arith.constant 0 : i32
    return %arg0, %c0_i32, %c0_i32_0 : i32, i32, i32
  }
  func.func @transform_5(%arg0: i32) -> (i32, i32, i32) {
    %c0_i32 = arith.constant 0 : i32
    %c0_i32_0 = arith.constant 0 : i32
    %c0_i32_1 = arith.constant 0 : i32
    return %arg0, %c0_i32, %c0_i32_0 : i32, i32, i32
  }
  func.func @transform_6(%arg0: i32) -> (i32, i32, i32) {
    %c0_i32 = arith.constant 0 : i32
    %c0_i32_0 = arith.constant 0 : i32
    %c0_i32_1 = arith.constant 0 : i32
    return %arg0, %c0_i32, %c0_i32_0 : i32, i32, i32
  }
  func.func @transform_7(%arg0: i32) -> (i32, i32, i32) {
    %c0_i32 = arith.constant 0 : i32
    %c0_i32_0 = arith.constant 0 : i32
    %c0_i32_1 = arith.constant 0 : i32
    return %arg0, %c0_i32, %c0_i32_0 : i32, i32, i32
  }
  func.func @transform_8(%arg0: i32) -> (i32, i32, i32) {
    %c0_i32 = arith.constant 0 : i32
    %c0_i32_0 = arith.constant 0 : i32
    %c0_i32_1 = arith.constant 0 : i32
    return %arg0, %c0_i32, %c0_i32_0 : i32, i32, i32
  }
  func.func @transform_9(%arg0: i32) -> (i32, i32, i32) {
    %c0_i32 = arith.constant 0 : i32
    %c0_i32_0 = arith.constant 0 : i32
    %c0_i32_1 = arith.constant 0 : i32
    return %arg0, %c0_i32, %c0_i32_0 : i32, i32, i32
  }
  func.func @transform_10(%arg0: i32) -> (i32, i32, i32) {
    %c0_i32 = arith.constant 0 : i32
    %c0_i32_0 = arith.constant 0 : i32
    %c0_i32_1 = arith.constant 0 : i32
    return %arg0, %c0_i32, %c0_i32_0 : i32, i32, i32
  }
  func.func @transform_11(%arg0: i32) -> (i32, i32, i32) {
    %c0_i32 = arith.constant 0 : i32
    %c0_i32_0 = arith.constant 0 : i32
    %c0_i32_1 = arith.constant 0 : i32
    return %arg0, %c0_i32, %c0_i32_0 : i32, i32, i32
  }
  func.func @transform_12(%arg0: i32) -> (i32, i32, i32) {
    %c0_i32 = arith.constant 0 : i32
    %c0_i32_0 = arith.constant 0 : i32
    %c0_i32_1 = arith.constant 0 : i32
    return %arg0, %c0_i32, %c0_i32_0 : i32, i32, i32
  }
  func.func @transform_13(%arg0: i32) -> (i32, i32, i32) {
    %c0_i32 = arith.constant 0 : i32
    %c0_i32_0 = arith.constant 0 : i32
    %c0_i32_1 = arith.constant 0 : i32
    return %arg0, %c0_i32, %c0_i32_0 : i32, i32, i32
  }
  func.func @transform_14(%arg0: i32) -> (i32, i32, i32) {
    %c0_i32 = arith.constant 0 : i32
    %c0_i32_0 = arith.constant 0 : i32
    %c0_i32_1 = arith.constant 0 : i32
    return %arg0, %c0_i32, %c0_i32_0 : i32, i32, i32
  }
  func.func @transform_15(%arg0: i32) -> (i32, i32) {
    %c0_i32 = arith.constant 0 : i32
    %c0_i32_0 = arith.constant 0 : i32
    %c0_i32_1 = arith.constant 0 : i32
    return %c0_i32, %c0_i32_0 : i32, i32
  }
}

</mosaic_0001>

<bundles_post_ra>
// kernel: tpu_custom_call.1
= control target key start
LH: loop header
LB: loop body
LE: loop exit
PB: predicated region body
PF: predicated region fallthrough
CT: control target
= control target key end

     0   :  { %s2965_s0 = inlined_call_operand.vmem [shape: f32[16,32], index: 0, kind: input, shape index: {}]   ;;  %s2966_s1 = inlined_call_operand.vmem [shape: bf16[16,32], index: 1, kind: input, shape index: {}]   ;;  %s2967_s2 = inlined_call_operand.vmem [shape: f32[2,8,8], index: 2, kind: input, shape index: {}]   ;;  %s2968_s3 = inlined_call_operand.vmem [shape: bf16[2,32,32], index: 3, kind: input, shape index: {}]   ;;  %s2969_s4 = inlined_call_operand.vmem [shape: f32[2,1,32], index: 4, kind: input, shape index: {}]   ;;  %s2970_s5 = inlined_call_operand.vmem [shape: f32[2,1,32], index: 5, kind: input, shape index: {}]   ;;  %s2971_s6 = inlined_call_operand.vmem [shape: bf16[2,32,32], index: 6, kind: input, shape index: {}]   ;;  %s2972_s7 = inlined_call_operand.vmem [shape: f32[2,1,32], index: 7, kind: input, shape index: {}]   ;;  %s2973_s8 = inlined_call_operand.vmem [shape: f32[2,1,32], index: 8, kind: input, shape index: {}]   ;;  %s2974_s9 = inlined_call_operand.vmem [shape: bf16[2,32,128], index: 9, kind: input, shape index: {}]   ;;  %s2975_s10 = inlined_call_operand.vmem [shape: f32[2,1,128], index: 10, kind: input, shape index: {}]   ;;  %s2976_s11 = inlined_call_operand.vmem [shape: bf16[2,128,32], index: 11, kind: input, shape index: {}]   ;;  %s2977_s12 = inlined_call_operand.vmem [shape: f32[2,1,32], index: 12, kind: input, shape index: {}]   ;;  %s2978_s13 = inlined_call_operand.vmem [shape: f32[2,1,32], index: 13, kind: input, shape index: {}]   ;;  %s2979_s14 = inlined_call_operand.vmem [shape: f32[2,1,32], index: 14, kind: input, shape index: {}]   ;;  %s2980_s15 = inlined_call_operand.hbm [shape: f32[16,32], index: 15, kind: output, shape index: {}]  }
   0x1   :  { %2985 = sst [smem:[#allocation8_spill]] %s2966_s1 }
   0x2   :  { %2986 = sst [smem:[#allocation9_spill]] %s2967_s2 }
   0x3   :  { %2987 = sst [smem:[#allocation10_spill]] %s2968_s3 }
   0x4   :  { %2988 = sst [smem:[#allocation11_spill]] %s2971_s6 }
   0x5   :  { %2989 = sst [smem:[#allocation12_spill]] %s2980_s15 }
   0x6   :  { %20 = vsyncpa [#allocation4], 0  ;;  %s2523_s18 = smov 0  }
   0x7 LB: > { %2990 = sst [smem:[#allocation6_spill]] %s2432_s18  ;;  %s2529_s19 = sadd.s32 4294967295, %s2432_s18   ;;  %s2432_s18 = sphi %s2523_s18, %s26_s18  }
   0x8   : > { %p2161_p0 = scmp.ge.s32.totalorder %s2432_s18, 1  ;;  %p527_p1 = scmp.lt.s32.totalorder %s2432_s18, 3 }
   0xa   : > { %p528_p2 = pnand %p2161_p0, %p527_p1 }
   0xc   : > { %531 = sbr.rel (%p528_p2) target bundleno = 3335 (0xd07), region = 80 }
  0x11   : > { %p609_p3 = scmp.lt.s32.totalorder %s2529_s19, 1  ;;  %s2991_s3 = sld [smem:[#allocation10_spill]] }
  0x12   : > { %s2992_s6 = sld [smem:[#allocation11_spill]]  ;;  %p2170_p4 = scmp.ne.s32.totalorder %s2529_s19, 0 }
  0x13   : > { %s2535_s20 = scalar_select %p609_p3, %s2529_s19, 1 }
  0x15   : > { %s2267_s21 = sshll.u32 %s2535_s20, 4  ;;  %s638_s30 = scalar_lea.vmem %s2975_s10, %s2535_s20 }
  0x16   : > { %s2270_s16 = sshll.u32 %s2535_s20, 6  ;;  %s646_s22 = scalar_lea.vmem %s2977_s12, %s2535_s20 }
  0x17   : > { %s2545_s27 = scalar_lea.vmem %s2991_s3, %s2267_s21  ;;  %s2567_s3 = scalar_lea.vmem %s2974_s9, %s2267_s21 }
  0x18   : > { %s2554_s18 = scalar_lea.vmem %s2992_s6, %s2267_s21  ;;  %657 = sbr.rel (%p2170_p4) target bundleno = 32 (0x20), region = 84 }
  0x19   : > { %2993 = sst [smem:[#allocation7_spill]] %s2554_s18  ;;  %s2577_s18 = scalar_lea.vmem %s2976_s11, %s2270_s16 }
  0x1d   : > { %v658_v0 = vld [vmem:[%s2965_s0] sm:$0xff]  ;;  %vm660_vm0 = vcmask 261120   ;;  %v659_v1 = vld [vmem:[%s2965_s0 + $0x8] sm:$0xff] }
  0x1e   : > { %661 = vst.msk [vmem:[#allocation3] sm:$0xff] %vm660_vm0, %v658_v0 }
  0x1f   : > { %662 = vst.msk [vmem:[#allocation3 + $0x8] sm:$0xff] %vm660_vm0, %v659_v1 }
  0x20 PF: > { %vm674_vm1 = vcmask 64512   ;;  %s2434_s24 = smov 104   ;;  %s2994_s15 = sld [smem:[#allocation9_spill]]  ;;  %vm711_vm3 = vcmask 1043456   ;;  %vm786_vm5 = vcmask 130112   ;;  %vm845_vm6 = vcmask 195712  }
  0x21   : > { %s2435_s23 = smov 120   ;;  %s2436_s21 = smov 112   ;;  %vm904_vm7 = vcmask 261312   ;;  %vm1152_vm8 = vcmask 261120  }
  0x22   : > { %s2437_s29 = smov 8   ;;  %s2438_s6 = smov 16  }
  0x23   : > { %s2439_s16 = smov 24   ;;  %s2995_s1 = sld [smem:[#allocation8_spill]] }
  0x24   : > { %s2997_s25 = scalar_lea.vmem %s2970_s5, %s2535_s20  ;;  %s3000_s26 = scalar_lea.vmem %s2973_s8, %s2535_s20 }
  0x25   : > { %v2598_v2 = vld [vmem:[#allocation3] sm:$0xff]  ;;  %p2289_p5 = scmp.eq.s32.totalorder %s2529_s19, 1  ;;  %s2442_s28 = smov 128  }
  0x26   : > { %v673_v3 = vpack.c.bf16 %v2598_v2, %v2598_v2  ;;  %v2608_v5 = vld [vmem:[%s2994_s15] sm:$0xff]  ;;  %v2616_v12 = vld [vmem:[#allocation3 + $0x8] sm:$0xff]  ;;  %v2179_v0 = vld [vmem:[%s2994_s15 + $0x8] sm:$0xff] }
  0x27   : > { %vm672_vm2 = vcmp.eq.f32.partialorder %v2608_v5, 0.0  ;;  %v2621_v14 = vpack.c.bf16 %v2616_v12, %v2616_v12  ;;  %vm908_vm4 = vcmp.eq.f32.partialorder %v2179_v0, 0.0 }
  0x28   : > { %v676_v4 = vsel %vm674_vm1, %v673_v3, 0  ;;  %847 = vrot.lane.b32.xlu2 %v673_v3, %s2434_s24  ;;  %729 = vrot.lane.b32.xlu1 %v673_v3, %s2435_s23  ;;  %v712_v20 = vsel %vm711_vm3, %v673_v3, 0 }
  0x29   : > { %685 = vmatpush.bf16.xpose.msra.mxu0 %v676_v4  ;;  %721 = vmatpush.bf16.msra.mxu1 %v712_v20  ;;  %v911_v43 = vsel %vm674_vm1, %v2621_v14, 0 }
  0x30   : > { %2171 = vmatmul.msk.bf16.vlgmr.msra.gmra.mxu0 %vm674_vm1, %v673_v3  ;;  %788 = vrot.lane.b32.xlu1 %v673_v3, %s2436_s21 }
  0x31   : > { %963 = vrot.lane.b32.xlu2 %v2621_v14, %s2435_s23 }
  0x38   : > { %1079 = vrot.lane.b32.xlu1 %v2621_v14, %s2434_s24 }
  0x82   : > { %v848_v11 = vpop.permute.xlu2 %847 }
  0x83   : > { %v850_v13 = vsel %vm674_vm1, %v848_v11, 0  ;;  %v885_v35 = vsel %vm711_vm3, %v848_v11, 0 }
  0x84   : > { %859 = vmatpush.bf16.xpose.msrb.mxu0 %v850_v13  ;;  %894 = vmatpush.bf16.msra.mxu2 %v885_v35 }
  0x8b   : > { %2177 = vmatmul.msk.bf16.vlgmr.msrb.gmra.mxu0 %vm674_vm1, %v848_v11  ;;  %v964_v32 = vpop.permute.xlu2 %963 }
  0x8c   : > { %v966_v36 = vsel %vm674_vm1, %v964_v32, 0  ;;  %v1001_v44 = vsel %vm711_vm3, %v964_v32, 0 }
  0x8d   : > { %975 = vmatpush.bf16.xpose.msra.mxu0 %v966_v36  ;;  %1010 = vmatpush.bf16.msrb.mxu2 %v1001_v44 }
  0x9a   : > { %v730_v21 = vpop.permute.xlu1 %729 }
  0x9b   : > { %v732_v22 = vsel %vm674_vm1, %v730_v21, 0  ;;  %v767_v23 = vsel %vm711_vm3, %v730_v21, 0  ;;  %2182 = vmatmul.msk.bf16.vlgmr.msra.gmra.mxu0 %vm674_vm1, %v964_v32 }
  0x9c   : > { %741 = vmatpush.bf16.xpose.msrb.mxu1 %v732_v22  ;;  %776 = vmatpush.bf16.msra.mxu3 %v767_v23 }
  0xa2   : > { %v789_v25 = vpop.permute.xlu1 %788 }
  0xa3   : > { %v826_v26 = vsel %vm711_vm3, %v789_v25, 0  ;;  %v791_v34 = vsel %vm674_vm1, %v789_v25, 0 }
  0xa4   : > { %835 = vmatpush.bf16.msrb.mxu3 %v826_v26 }
  0xaa   : > { %v2643_v42 = vpop.permute.xlu1 %1079 }
  0xab   : > { %v1082_v45 = vsel %vm674_vm1, %v2643_v42, 0  ;;  %v1117_v0 = vsel %vm711_vm3, %v2643_v42, 0 }
  0xac   : > { %1091 = vmatpush.bf16.xpose.msrb.mxu0 %v1082_v45 }
  0xad   : > { %v687_v6 = vpop.f32.mrf.mxu0 }
  0xae   : > { %v691_v7 = vsel %vm672_vm2, -1e+20, %v687_v6 }
  0xaf   : > { %v692_v8 = vmul.f32 5.656854, %v691_v7 }
  0xb1   : > { %v693_v9 = vsel %vm674_vm1, %v692_v8, -inf }
  0xb2   : > { %694 = vmax.xlane.f32.xlu0 %v693_v9 }
  0xb3   : > { %2186 = vmatmul.msk.bf16.vlgmr.msrb.gmra.mxu0 %vm674_vm1, %v2643_v42 }
  0xb5   : > { %v689_v10 = vpop.f32.mrf.mxu0 }
 0x108   : > { %v861_v37 = vpop.f32.mrf.mxu0 }
 0x109   : > { %v865_v38 = vsel %vm672_vm2, -1e+20, %v861_v37 }
 0x10a   : > { %v866_v39 = vmul.f32 5.656854, %v865_v38 }
 0x10c   : > { %v867_v40 = vsel %vm674_vm1, %v866_v39, -inf }
 0x110   : > { %v863_v41 = vpop.f32.mrf.mxu0 }
 0x118   : > { %v977_v50 = vpop.f32.mrf.mxu0 }
 0x119   : > { %v981_v5 = vsel %vm908_vm4, -1e+20, %v977_v50 }
 0x120   : > { %v979_v53 = vpop.f32.mrf.mxu0 }
 0x125   : > { %v695_v15 = vpop.xlane.xlu0 %694 }
 0x126   : > { %v696_v16 = vsub.f32 %v692_v8, %v695_v15  ;;  %v982_v8 = vmul.f32 5.656854, %v981_v5 }
 0x128   : > { %v697_v17 = vmul.f32 1.442695, %v696_v16  ;;  %v983_v13 = vsel %vm674_vm1, %v982_v8, -inf }
 0x12a   : > { %2316 = vpow2.f32 %v697_v17 }
 0x130   : > { %v2317_v18 = vpop.eup %2316  ;;  %v1093_v57 = vpop.f32.mrf.mxu0 }
 0x131   : > { %v699_v19 = vsel %vm674_vm1, %v2317_v18, 0.0  ;;  %v1097_v11 = vsel %vm908_vm4, -1e+20, %v1093_v57 }
 0x132   : > { %700 = vadd.xlane.f32.xlu0 %v699_v19  ;;  %v1098_v15 = vmul.f32 5.656854, %v1097_v11 }
 0x134   : > { %v1099_v20 = vsel %vm674_vm1, %v1098_v15, -inf }
 0x138   : > { %v1095_v60 = vpop.f32.mrf.mxu0 }
 0x146   : > { %1021 = vrot.lane.b32.xlu0 %v2621_v14, %s2436_s21 }
 0x170   : > { %868 = vmax.xlane.f32.xlu0 %v867_v40 }
 0x1a5   : > { %v701_v24 = vpop.xlane.xlu0 %700 }
 0x1a6   : > { %2318 = vrcp.f32 %v701_v24 }
 0x1ac   : > { %v2319_v27 = vpop.eup %2318 }
 0x1ad   : > { %v703_v28 = vmul.f32 %v2319_v27, %v701_v24 }
 0x1af   : > { %v704_v29 = vsub.f32 2.0, %v703_v28 }
 0x1b1   : > { %v705_v30 = vmul.f32 %v2319_v27, %v704_v29 }
 0x1b3   : > { %v706_v31 = vmul.f32 %v2317_v18, %v705_v30 }
 0x1b5   : > { %v707_v33 = vpack.c.bf16 %v706_v31, %v706_v31 }
 0x1b7   : > { %2172 = vmatmul.msk.bf16.vlgmr.msra.gmra.mxu1 %vm674_vm1, %v707_v33 }
 0x1b8   : > { %800 = vmatpush.bf16.xpose.msra.mxu1 %v791_v34  ;;  %v2653_v46 = vpop.permute.xlu0 %1021 }
 0x1b9   : > { %v1024_v47 = vsel %vm674_vm1, %v2653_v46, 0 }
 0x1c7   : > { %2173 = vmatmul.msk.bf16.vlgmr.msrb.gmra.mxu1 %vm674_vm1, %v730_v21 }
 0x1c8   : > { %920 = vmatpush.bf16.xpose.msrb.mxu1 %v911_v43 }
 0x1d7   : > { %2175 = vmatmul.msk.bf16.vlgmr.msra.gmra.mxu1 %vm674_vm1, %v789_v25 }
 0x1d8   : > { %1033 = vmatpush.bf16.xpose.msra.mxu1 %v1024_v47 }
 0x1e3   : > { %v869_v7 = vpop.xlane.xlu0 %868 }
 0x1e4   : > { %v870_v10 = vsub.f32 %v866_v39, %v869_v7 }
 0x1e6   : > { %v871_v16 = vmul.f32 1.442695, %v870_v10  ;;  %v946_v10 = vsel %vm711_vm3, %v2621_v14, 0 }
 0x1e7   : > { %2180 = vmatmul.msk.bf16.vlgmr.msrb.gmra.mxu1 %vm674_vm1, %v2621_v14 }
 0x1e8   : > { %2320 = vpow2.f32 %v871_v16 }
 0x1ee   : > { %v2321_v23 = vpop.eup %2320 }
 0x1ef   : > { %v873_v24 = vsel %vm674_vm1, %v2321_v23, 0.0 }
 0x1f7   : > { %2184 = vmatmul.msk.bf16.vlgmr.msra.gmra.mxu1 %vm674_vm1, %v2653_v46 }
 0x234   : > { %v723_v48 = vpop.f32.mrf.mxu1 }
 0x235   : > { %727 = vst.msk [vmem:[#allocation2] sm:$0xff] %vm674_vm1, %v723_v48 }
 0x23c   : > { %v725_v49 = vpop.f32.mrf.mxu1 }
 0x244   : > { %v743_v51 = vpop.f32.mrf.mxu1 }
 0x245   : > { %v747_v52 = vsel %vm672_vm2, -1e+20, %v743_v51 }
 0x246   : > { %v748_v54 = vmul.f32 5.656854, %v747_v52 }
 0x248   : > { %v749_v55 = vsel %vm674_vm1, %v748_v54, -inf }
 0x249   : > { %750 = vmax.xlane.f32.xlu2 %v749_v55 }
 0x24c   : > { %v745_v56 = vpop.f32.mrf.mxu1 }
 0x254   : > { %v802_v58 = vpop.f32.mrf.mxu1 }
 0x255   : > { %v806_v59 = vsel %vm672_vm2, -1e+20, %v802_v58 }
 0x256   : > { %v807_v61 = vmul.f32 5.656854, %v806_v59 }
 0x258   : > { %v808_v62 = vsel %vm674_vm1, %v807_v61, -inf }
 0x259   : > { %809 = vmax.xlane.f32.xlu1 %v808_v62 }
 0x25c   : > { %v804_v63 = vpop.f32.mrf.mxu1 }
 0x264   : > { %v922_v1 = vpop.f32.mrf.mxu1 }
 0x265   : > { %v926_v3 = vsel %vm908_vm4, -1e+20, %v922_v1 }
 0x266   : > { %v927_v4 = vmul.f32 5.656854, %v926_v3 }
 0x268   : > { %v928_v6 = vsel %vm674_vm1, %v927_v4, -inf }
 0x269   : > { %929 = vmax.xlane.f32.xlu2 %v928_v6 }
 0x26c   : > { %v924_v9 = vpop.f32.mrf.mxu1 }
 0x271   : > { %984 = vmax.xlane.f32.xlu2 %v983_v13 }
 0x274   : > { %v1035_v17 = vpop.f32.mrf.mxu1 }
 0x275   : > { %v1039_v18 = vsel %vm908_vm4, -1e+20, %v1035_v17 }
 0x276   : > { %v1040_v19 = vmul.f32 5.656854, %v1039_v18 }
 0x278   : > { %v1041_v21 = vsel %vm674_vm1, %v1040_v19, -inf }
 0x279   : > { %1042 = vmax.xlane.f32.xlu1 %v1041_v21  ;;  %1100 = vmax.xlane.f32.xlu2 %v1099_v20 }
 0x27c   : > { %v1037_v22 = vpop.f32.mrf.mxu1 }
 0x281   : > { %874 = vadd.xlane.f32.xlu2 %v873_v24 }
 0x2bc   : > { %v751_v25 = vpop.xlane.xlu2 %750 }
 0x2bd   : > { %v752_v26 = vsub.f32 %v748_v54, %v751_v25 }
 0x2bf   : > { %v753_v27 = vmul.f32 1.442695, %v752_v26 }
 0x2c1   : > { %2322 = vpow2.f32 %v753_v27 }
 0x2c7   : > { %v2323_v28 = vpop.eup %2322 }
 0x2c8   : > { %v755_v29 = vsel %vm674_vm1, %v2323_v28, 0.0 }
 0x2c9   : > { %756 = vadd.xlane.f32.xlu1 %v755_v29 }
 0x2cc   : > { %v810_v30 = vpop.xlane.xlu1 %809 }
 0x2cd   : > { %v811_v31 = vsub.f32 %v807_v61, %v810_v30 }
 0x2cf   : > { %v812_v32 = vmul.f32 1.442695, %v811_v31 }
 0x2d1   : > { %2324 = vpow2.f32 %v812_v32 }
 0x2d7   : > { %v2325_v33 = vpop.eup %2324 }
 0x2d8   : > { %v814_v34 = vsel %vm674_vm1, %v2325_v33, 0.0 }
 0x2d9   : > { %815 = vadd.xlane.f32.xlu0 %v814_v34 }
 0x2dc   : > { %v930_v35 = vpop.xlane.xlu2 %929 }
 0x2dd   : > { %v931_v36 = vsub.f32 %v927_v4, %v930_v35 }
 0x2df   : > { %v932_v37 = vmul.f32 1.442695, %v931_v36 }
 0x2e1   : > { %2326 = vpow2.f32 %v932_v37 }
 0x2e4   : > { %v985_v38 = vpop.xlane.xlu2 %984 }
 0x2e5   : > { %v986_v39 = vsub.f32 %v982_v8, %v985_v38 }
 0x2e7   : > { %v2683_v40 = vpop.eup %2326  ;;  %v987_v41 = vmul.f32 1.442695, %v986_v39 }
 0x2e8   : > { %v934_v43 = vsel %vm674_vm1, %v2683_v40, 0.0 }
 0x2e9   : > { %2328 = vpow2.f32 %v987_v41  ;;  %935 = vadd.xlane.f32.xlu1 %v934_v43 }
 0x2ec   : > { %v1043_v44 = vpop.xlane.xlu1 %1042  ;;  %v1101_v45 = vpop.xlane.xlu2 %1100 }
 0x2ed   : > { %v1044_v47 = vsub.f32 %v1040_v19, %v1043_v44  ;;  %v1102_v48 = vsub.f32 %v1098_v15, %v1101_v45  ;;  %v1059_v19 = vsel %vm711_vm3, %v2653_v46, 0 }
 0x2ef   : > { %v2687_v49 = vpop.eup %2328  ;;  %v1045_v50 = vmul.f32 1.442695, %v1044_v47  ;;  %v1103_v51 = vmul.f32 1.442695, %v1102_v48 }
 0x2f0   : > { %v989_v52 = vsel %vm674_vm1, %v2687_v49, 0.0 }
 0x2f1   : > { %2330 = vpow2.f32 %v1045_v50  ;;  %990 = vadd.xlane.f32.xlu0 %v989_v52 }
 0x2f2   : > { %2332 = vpow2.f32 %v1103_v51 }
 0x2f4   : > { %v875_v53 = vpop.xlane.xlu2 %874 }
 0x2f5   : > { %2334 = vrcp.f32 %v875_v53 }
 0x2f7   : > { %v2691_v54 = vpop.eup %2330 }
 0x2f8   : > { %v2693_v55 = vpop.eup %2332  ;;  %v1047_v56 = vsel %vm674_vm1, %v2691_v54, 0.0 }
 0x2f9   : > { %1048 = vadd.xlane.f32.xlu2 %v1047_v56  ;;  %v1105_v57 = vsel %vm674_vm1, %v2693_v55, 0.0 }
 0x2fa   : > { %1106 = vadd.xlane.f32.xlu1 %v1105_v57 }
 0x2fb   : > { %v2335_v58 = vpop.eup %2334 }
 0x2fc   : > { %v877_v59 = vmul.f32 %v2335_v58, %v875_v53 }
 0x2fe   : > { %v878_v60 = vsub.f32 2.0, %v877_v59 }
 0x300   : > { %v879_v61 = vmul.f32 %v2335_v58, %v878_v60 }
 0x302   : > { %v880_v62 = vmul.f32 %v2321_v23, %v879_v61 }
 0x304   : > { %v881_v63 = vpack.c.bf16 %v880_v62, %v880_v62 }
 0x306   : > { %2178 = vmatmul.msk.bf16.vlgmr.msra.gmra.mxu2 %vm674_vm1, %v881_v63 }
 0x307   : > { %1126 = vmatpush.bf16.msra.mxu2 %v1117_v0 }
 0x33c   : > { %v757_v1 = vpop.xlane.xlu1 %756 }
 0x33d   : > { %2336 = vrcp.f32 %v757_v1 }
 0x343   : > { %v2337_v3 = vpop.eup %2336 }
 0x344   : > { %v759_v4 = vmul.f32 %v2337_v3, %v757_v1  ;;  %v2272_v1 = vld [vmem:[%s2545_s27 + $0x8] sm:$0xff] }
 0x345   : > { %1162 = vmatpush.bf16.msrb.mxu1 %v2272_v1 }
 0x346   : > { %v760_v6 = vsub.f32 2.0, %v759_v4 }
 0x348   : > { %v761_v5 = vmul.f32 %v2337_v3, %v760_v6  ;;  %v2271_v3 = vld [vmem:[%s2545_s27] sm:$0xff]  ;;  %s2996_s27 = scalar_lea.vmem %s2969_s4, %s2535_s20 }
 0x349   : > { %1163 = vmatpush.bf16.msrb.mxu1 %v2271_v3 }
 0x34a   : > { %v762_v7 = vmul.f32 %v2323_v28, %v761_v5 }
 0x34c   : > { %v816_v8 = vpop.xlane.xlu0 %815  ;;  %v763_v9 = vpack.c.bf16 %v762_v7, %v762_v7 }
 0x34d   : > { %2338 = vrcp.f32 %v816_v8 }
 0x34e   : > { %2174 = vmatmul.msk.bf16.vlgmr.msra.gmra.mxu3 %vm674_vm1, %v763_v9 }
 0x34f   : > { %955 = vmatpush.bf16.msra.mxu3 %v946_v10 }
 0x353   : > { %v2339_v11 = vpop.eup %2338 }
 0x354   : > { %v818_v13 = vmul.f32 %v2339_v11, %v816_v8 }
 0x356   : > { %v819_v42 = vsub.f32 2.0, %v818_v13 }
 0x358   : > { %v820_v15 = vmul.f32 %v2339_v11, %v819_v42 }
 0x35a   : > { %v821_v16 = vmul.f32 %v2325_v33, %v820_v15 }
 0x35c   : > { %v822_v17 = vpack.c.bf16 %v821_v16, %v821_v16  ;;  %v936_v18 = vpop.xlane.xlu1 %935  ;;  %v2440_v16 = vmov 32.0  }
 0x35d   : > { %2340 = vrcp.f32 %v936_v18 }
 0x35e   : > { %2176 = vmatmul.msk.bf16.vlgmr.msrb.gmra.mxu3 %vm674_vm1, %v822_v17 }
 0x35f   : > { %1068 = vmatpush.bf16.msrb.mxu3 %v1059_v19  ;;  %v2739_v19 = vld [vmem:[%s2995_s1] sm:$0xf] }
 0x363   : > { %v2341_v20 = vpop.eup %2340 }
 0x364   : > { %v938_v14 = vmul.f32 %v2341_v20, %v936_v18  ;;  %v991_v21 = vpop.xlane.xlu0 %990 }
 0x365   : > { %2342 = vrcp.f32 %v991_v21 }
 0x366   : > { %v939_v22 = vsub.f32 2.0, %v938_v14 }
 0x368   : > { %v940_v23 = vmul.f32 %v2341_v20, %v939_v22 }
 0x36a   : > { %v941_v24 = vmul.f32 %v2683_v40, %v940_v23 }
 0x36b   : > { %v2343_v25 = vpop.eup %2342 }
 0x36c   : > { %v942_v26 = vpack.c.bf16 %v941_v24, %v941_v24  ;;  %v993_v27 = vmul.f32 %v2343_v25, %v991_v21  ;;  %v1049_v28 = vpop.xlane.xlu2 %1048 }
 0x36d   : > { %v1107_v29 = vpop.xlane.xlu1 %1106  ;;  %2344 = vrcp.f32 %v1049_v28 }
 0x36e   : > { %v994_v30 = vsub.f32 2.0, %v993_v27  ;;  %2346 = vrcp.f32 %v1107_v29  ;;  %2181 = vmatmul.msk.bf16.vlgmr.msra.gmra.mxu3 %vm674_vm1, %v942_v26 }
 0x36f   : > { %2348 = vrcp.f32 %v2440_v16 }
 0x370   : > { %v995_v46 = vmul.f32 %v2343_v25, %v994_v30 }
 0x372   : > { %v996_v31 = vmul.f32 %v2687_v49, %v995_v46 }
 0x373   : > { %v2345_v32 = vpop.eup %2344 }
 0x374   : > { %v2347_v33 = vpop.eup %2346  ;;  %v997_v34 = vpack.c.bf16 %v996_v31, %v996_v31  ;;  %v1051_v35 = vmul.f32 %v2345_v32, %v1049_v28 }
 0x375   : > { %v1109_v36 = vmul.f32 %v2347_v33, %v1107_v29  ;;  %v2349_v17 = vpop.eup %2348 }
 0x376   : > { %v1052_v37 = vsub.f32 2.0, %v1051_v35  ;;  %2183 = vmatmul.msk.bf16.vlgmr.msrb.gmra.mxu2 %vm674_vm1, %v997_v34  ;;  %v1181_v18 = vmul.f32 32.0, %v2349_v17  ;;  %vm1185_vm9 = vweird.f32 %v2349_v17 }
 0x377   : > { %v1110_v38 = vsub.f32 2.0, %v1109_v36 }
 0x378   : > { %v1053_v39 = vmul.f32 %v2345_v32, %v1052_v37  ;;  %v1182_v20 = vsub.f32 1.0, %v1181_v18  ;;  %v1244_v32 = vsel %vm674_vm1, %v2739_v19, 0 }
 0x379   : > { %v1111_v41 = vmul.f32 %v2347_v33, %v1110_v38  ;;  %1253 = vmatpush.bf16.xpose.msra.mxu3 %v1244_v32 }
 0x37a   : > { %v1054_v40 = vmul.f32 %v2691_v54, %v1053_v39 }
 0x37b   : > { %v1112_v44 = vmul.f32 %v2693_v55, %v1111_v41 }
 0x37c   : > { %v1055_v43 = vpack.c.bf16 %v1054_v40, %v1054_v40 }
 0x37d   : > { %v1113_v45 = vpack.c.bf16 %v1112_v44, %v1112_v44 }
 0x37e   : > { %2185 = vmatmul.msk.bf16.vlgmr.msrb.gmra.mxu3 %vm674_vm1, %v1055_v43 }
 0x386   : > { %2187 = vmatmul.msk.bf16.vlgmr.msra.gmra.mxu2 %vm674_vm1, %v1113_v45 }
 0x389   : > { %v896_v47 = vpop.f32.mrf.mxu2 }
 0x391   : > { %v898_v48 = vpop.f32.mrf.mxu2 }
 0x3d1   : > { %v778_v49 = vpop.f32.mrf.mxu3 }
 0x3d2   : > { %783 = vrot.lane.b32.xlu0 %v778_v49, %s2437_s29  ;;  %v2308_v49 = vld [vmem:[%s2996_s27] ss:$0 sm:$0xff] }
 0x3d9   : > { %v780_v50 = vpop.f32.mrf.mxu3 }
 0x3e1   : > { %v837_v51 = vpop.f32.mrf.mxu3 }
 0x3e2   : > { %842 = vrot.lane.b32.xlu1 %v837_v51, %s2438_s6 }
 0x3e9   : > { %v839_v52 = vpop.f32.mrf.mxu3 }
 0x3f1   : > { %v957_v53 = vpop.f32.mrf.mxu3 }
 0x3f2   : > { %961 = vst.msk [vmem:[#allocation2 + $0x8] sm:$0xff] %vm674_vm1, %v957_v53  ;;  %v2309_v53 = vld [vmem:[%s2997_s25] ss:$0 sm:$0xff] }
 0x3f9   : > { %v959_v54 = vpop.f32.mrf.mxu3  ;;  %v1012_v55 = vpop.f32.mrf.mxu2 }
 0x3fa   : > { %1017 = vrot.lane.b32.xlu2 %v1012_v55, %s2437_s29 }
 0x401   : > { %v1014_v56 = vpop.f32.mrf.mxu2  ;;  %v1070_v57 = vpop.f32.mrf.mxu3 }
 0x402   : > { %901 = vrot.lane.b32.xlu2 %v896_v47, %s2439_s16  ;;  %1075 = vrot.lane.b32.xlu0 %v1070_v57, %s2438_s6 }
 0x409   : > { %v1072_v58 = vpop.f32.mrf.mxu3  ;;  %v1128_v59 = vpop.f32.mrf.mxu2 }
 0x40a   : > { %1133 = vrot.lane.b32.xlu0 %v1128_v59, %s2439_s16 }
 0x411   : > { %v1130_v60 = vpop.f32.mrf.mxu2 }
 0x444   : > { %v784_v61 = vpop.permute.xlu0 %783 }
 0x445   : > { %787 = vst.msk [vmem:[#allocation2] sm:$0xff] %vm786_vm5, %v784_v61 }
 0x454   : > { %v843_v62 = vpop.permute.xlu1 %842  ;;  %v1018_v63 = vpop.permute.xlu2 %1017 }
 0x455   : > { %846 = vst.msk [vmem:[#allocation2] sm:$0xff] %vm845_vm6, %v843_v62 }
 0x456   : > { %1020 = vst.msk [vmem:[#allocation2 + $0x8] sm:$0xff] %vm786_vm5, %v1018_v63  ;;  %v2777_v63 = vld [vmem:[%s2995_s1 + $0x4] sm:$0xf] }
 0x457   : > { %v1543_v3 = vunpack.c.l.b16 %v2777_v63 }
 0x45c   : > { %v902_v0 = vpop.permute.xlu2 %901 }
 0x45d   : > { %905 = vst.msk [vmem:[#allocation2] sm:$0xff] %vm904_vm7, %v902_v0 }
 0x464   : > { %v1137_v5 = vld [vmem:[#allocation2] sm:$0xff] }
 0x474   : > { %v1076_v4 = vpop.permute.xlu0 %1075 }
 0x475   : > { %1078 = vst.msk [vmem:[#allocation2 + $0x8] sm:$0xff] %vm845_vm6, %v1076_v4 }
 0x47c   : > { %v1134_v6 = vpop.permute.xlu0 %1133 }
 0x47d   : > { %1136 = vst.msk [vmem:[#allocation2 + $0x8] sm:$0xff] %vm904_vm7, %v1134_v6 }
 0x484   : > { %v1138_v7 = vld [vmem:[#allocation2 + $0x8] sm:$0xff] }
 0x485   : > { %v1139_v8 = vpack.c.bf16 %v1138_v7, %v1137_v5 }
 0x487   : > { %2196 = vmatmul.msk.bf16.vlgmr.msrb.gmra.mxu1 %vm1152_vm8, %v1139_v8  ;;  %v1544_v8 = vpack.c.b16 %v1543_v3, %v1543_v3 }
 0x504   : > { %v1165_v9 = vpop.f32.mrf.mxu1 }
 0x505   : > { %v1170_v10 = vadd.f32 %v1165_v9, %v2598_v2  ;;  %v1298_v2 = vunpack.c.l.b16 %v2739_v19 }
 0x507   : > { %v1174_v11 = vsel %vm1152_vm8, %v1170_v10, 0.0  ;;  %v2742_v14 = vpack.c.b16 %v1298_v2, %v1298_v2 }
 0x508   : > { %1175 = vadd.xlane.f32.xlu1 %v1174_v11 }
 0x50c   : > { %v1167_v13 = vpop.f32.mrf.mxu1 }
 0x50d   : > { %v1171_v42 = vadd.f32 %v1167_v13, %v2616_v12  ;;  %v1183_v12 = vmul.f32 %v2349_v17, %v1182_v20 }
 0x50f   : > { %v1177_v15 = vsel %vm1152_vm8, %v1171_v42, 0.0  ;;  %v1184_v21 = vadd.f32 %v2349_v17, %v1183_v12 }
 0x510   : > { %1178 = vadd.xlane.f32.xlu2 %v1177_v15 }
 0x511   : > { %v2746_v22 = vsel %vm1185_vm9, %v2349_v17, %v1184_v21 }
 0x528   : > { %1300 = vrot.lane.b32.xlu2 %v2742_v14, %s2435_s23 }
 0x57b   : > { %v1176_v23 = vpop.xlane.xlu1 %1175 }
 0x57c   : > { %v1187_v24 = vmul.f32 %v2746_v22, %v1176_v23 }
 0x57e   : > { %v1189_v25 = vsub.f32 %v1170_v10, %v1187_v24  ;;  %v1489_v10 = vsel %vm674_vm1, %v2777_v63, 0 }
 0x580   : > { %v1191_v26 = vmul.f32 %v1189_v25, %v1189_v25 }
 0x582   : > { %v1193_v27 = vsel %vm1152_vm8, %v1191_v26, 0.0 }
 0x583   : > { %1194 = vadd.xlane.f32.xlu0 %v1193_v27  ;;  %v1179_v28 = vpop.xlane.xlu2 %1178 }
 0x584   : > { %v1188_v29 = vmul.f32 %v2746_v22, %v1179_v28 }
 0x586   : > { %v1190_v30 = vsub.f32 %v1171_v42, %v1188_v29  ;;  %v1278_v42 = vsel %vm711_vm3, %v2739_v19, 0 }
 0x587   : > { %1287 = vmatpush.bf16.msra.mxu0 %v1278_v42 }
 0x588   : > { %v1192_v46 = vmul.f32 %v1190_v30, %v1190_v30 }
 0x58a   : > { %v1196_v31 = vsel %vm1152_vm8, %v1192_v46, 0.0 }
 0x58b   : > { %1197 = vadd.xlane.f32.xlu1 %v1196_v31  ;;  %v1301_v54 = vpop.permute.xlu2 %1300 }
 0x58c   : > { %v1306_v56 = vsel %vm674_vm1, %v1301_v54, 0  ;;  %v1340_v57 = vsel %vm711_vm3, %v1301_v54, 0 }
 0x58d   : > { %1315 = vmatpush.bf16.xpose.msrb.mxu2 %v1306_v56  ;;  %1349 = vmatpush.bf16.msra.mxu1 %v1340_v57 }
 0x5a4   : > { %1362 = vrot.lane.b32.xlu1 %v2742_v14, %s2436_s21 }
 0x5f6   : > { %v1195_v33 = vpop.xlane.xlu0 %1194 }
 0x5f7   : > { %v1199_v34 = vmul.f32 %v1195_v33, %v2746_v22 }
 0x5f9   : > { %v1201_v35 = vadd.f32 1e-05, %v1199_v34 }
 0x5fb   : > { %2350 = vrsqrt.f32 %v1201_v35  ;;  %vm1209_vm11 = vweird.f32 %v1201_v35 }
 0x5fe   : > { %v1198_v36 = vpop.xlane.xlu1 %1197 }
 0x5ff   : > { %v1200_v37 = vmul.f32 %v1198_v36, %v2746_v22 }
 0x601   : > { %v2351_v38 = vpop.eup %2350  ;;  %v1202_v39 = vadd.f32 1e-05, %v1200_v37 }
 0x602   : > { %v1204_v40 = vmul.f32 %v2351_v38, %v1201_v35  ;;  %vm1210_vm10 = vweird.f32 %v2351_v38 }
 0x603   : > { %2352 = vrsqrt.f32 %v1202_v39  ;;  %vm1211_vm12 = vmor %vm1209_vm11, %vm1210_vm10  ;;  %vm1219_vm14 = vweird.f32 %v1202_v39 }
 0x604   : > { %v1205_v41 = vmul.f32 %v2351_v38, %v1204_v40 }
 0x606   : > { %v1206_v43 = vmul.f32 0.5, %v1205_v41 }
 0x608   : > { %v1207_v44 = vsub.f32 1.5, %v1206_v43 }
 0x609   : > { %v2353_v45 = vpop.eup %2352 }
 0x60a   : > { %v1208_v47 = vmul.f32 %v2351_v38, %v1207_v44  ;;  %v1214_v48 = vmul.f32 %v2353_v45, %v1202_v39  ;;  %vm1220_vm13 = vweird.f32 %v2353_v45 }
 0x60b   : > { %vm1221_vm15 = vmor %vm1219_vm14, %vm1220_vm13 }
 0x60c   : > { %v1212_v50 = vsel %vm1211_vm12, %v2351_v38, %v1208_v47  ;;  %v1215_v51 = vmul.f32 %v2353_v45, %v1214_v48 }
 0x60d   : > { %v1223_v52 = vmul.f32 %v1212_v50, %v1189_v25 }
 0x60e   : > { %v1216_v55 = vmul.f32 0.5, %v1215_v51 }
 0x60f   : > { %v1228_v58 = vmul.f32 %v2308_v49, %v1223_v52 }
 0x610   : > { %v1217_v59 = vsub.f32 1.5, %v1216_v55 }
 0x611   : > { %v2770_v60 = vadd.f32 %v2309_v53, %v1228_v58 }
 0x612   : > { %v1218_v61 = vmul.f32 %v2353_v45, %v1217_v59 }
 0x613   : > { %v1239_v62 = vpack.c.bf16 %v2770_v60, %v2770_v60 }
 0x614   : > { %v1222_v0 = vsel %vm1221_vm15, %v2353_v45, %v1218_v61 }
 0x615   : > { %v1224_v1 = vmul.f32 %v1222_v0, %v1190_v30  ;;  %1295 = vrot.lane.b32.xlu0 %v1239_v62, %s2435_s23  ;;  %2197 = vmatmul.msk.bf16.vlgmr.msra.gmra.mxu3 %vm674_vm1, %v1239_v62 }
 0x616   : > { %1360 = vrot.lane.b32.xlu2 %v1239_v62, %s2436_s21  ;;  %1422 = vrot.lane.b32.xlu1 %v1239_v62, %s2434_s24  ;;  %v1363_v4 = vpop.permute.xlu1 %1362 }
 0x617   : > { %v1229_v6 = vmul.f32 %v2308_v49, %v1224_v1  ;;  %v1368_v5 = vsel %vm674_vm1, %v1363_v4, 0  ;;  %v1402_v11 = vsel %vm711_vm3, %v1363_v4, 0 }
 0x618   : > { %1377 = vmatpush.bf16.xpose.msrb.mxu3 %v1368_v5  ;;  %1411 = vmatpush.bf16.msrb.mxu0 %v1402_v11 }
 0x619   : > { %v2785_v7 = vadd.f32 %v2309_v53, %v1229_v6 }
 0x61b   : > { %v1484_v9 = vpack.c.bf16 %v2785_v7, %v2785_v7 }
 0x61d   : > { %1424 = vrot.lane.b32.xlu0 %v2742_v14, %s2434_s24 }
 0x61e   : > { %1607 = vrot.lane.b32.xlu1 %v1544_v8, %s2436_s21  ;;  %1540 = vrot.lane.b32.xlu2 %v1484_v9, %s2435_s23 }
 0x620   : > { %1498 = vmatpush.bf16.xpose.msra.mxu3 %v1489_v10 }
 0x625   : > { %1545 = vrot.lane.b32.xlu0 %v1544_v8, %s2435_s23  ;;  %s2441_s23 = smov [#allocation3]  }
 0x626   : > { %1667 = vrot.lane.b32.xlu1 %v1484_v9, %s2434_s24  ;;  %1605 = vrot.lane.b32.xlu2 %v1484_v9, %s2436_s21  ;;  %s2999_s21 = scalar_lea.vmem %s2972_s7, %s2535_s20 }
 0x62d   : > { %1669 = vrot.lane.b32.xlu0 %v1544_v8, %s2434_s24  ;;  %s2998_s24 = sld [smem:[#allocation7_spill]] }
 0x670   : > { %v1361_v13 = vpop.permute.xlu2 %1360 }
 0x671   : > { %2201 = vmatmul.msk.bf16.vlgmr.msrb.gmra.mxu3 %vm674_vm1, %v1361_v13 }
 0x678   : > { %v1541_v17 = vpop.permute.xlu2 %1540 }
 0x680   : > { %v1606_v21 = vpop.permute.xlu2 %1605 }
 0x681   : > { %2205 = vmatmul.msk.bf16.vlgmr.msra.gmra.mxu3 %vm674_vm1, %v1484_v9 }
 0x687   : > { %v1296_v15 = vpop.permute.xlu0 %1295 }
 0x688   : > { %v1423_v16 = vpop.permute.xlu1 %1422  ;;  %2199 = vmatmul.msk.bf16.vlgmr.msrb.gmra.mxu2 %vm674_vm1, %v1296_v15 }
 0x68f   : > { %v1425_v18 = vpop.permute.xlu0 %1424 }
 0x690   : > { %v1430_v2 = vsel %vm674_vm1, %v1425_v18, 0  ;;  %v1464_v20 = vsel %vm711_vm3, %v1425_v18, 0  ;;  %v2807_v14 = vpop.permute.xlu1 %1607 }
 0x691   : > { %v1613_v19 = vsel %vm674_vm1, %v2807_v14, 0  ;;  %1439 = vmatpush.bf16.xpose.msra.mxu2 %v1430_v2  ;;  %1473 = vmatpush.bf16.msrb.mxu1 %v1464_v20 }
 0x692   : > { %1622 = vmatpush.bf16.xpose.msrb.mxu3 %v1613_v19 }
 0x697   : > { %v2811_v12 = vpop.permute.xlu0 %1545 }
 0x698   : > { %v1255_v23 = vpop.f32.mrf.mxu3  ;;  %2203 = vmatmul.msk.bf16.vlgmr.msra.gmra.mxu2 %vm674_vm1, %v1423_v16  ;;  %v1551_v24 = vsel %vm674_vm1, %v2811_v12, 0  ;;  %v1668_v30 = vpop.permute.xlu1 %1667 }
 0x699   : > { %v1259_v25 = vmul.f32 5.656854, %v1255_v23  ;;  %2209 = vmatmul.msk.bf16.vlgmr.msrb.gmra.mxu3 %vm674_vm1, %v1606_v21  ;;  %1560 = vmatpush.bf16.xpose.msrb.mxu2 %v1551_v24 }
 0x69b   : > { %v1260_v26 = vsel %vm674_vm1, %v1259_v25, -inf }
 0x69c   : > { %1261 = vmax.xlane.f32.xlu0 %v1260_v26 }
 0x69f   : > { %v2818_v27 = vpop.permute.xlu0 %1669 }
 0x6a0   : > { %v1257_v28 = vpop.f32.mrf.mxu3  ;;  %v1675_v29 = vsel %vm674_vm1, %v2818_v27, 0 }
 0x6a1   : > { %1684 = vmatpush.bf16.xpose.msra.mxu2 %v1675_v29 }
 0x6a8   : > { %2207 = vmatmul.msk.bf16.vlgmr.msrb.gmra.mxu2 %vm674_vm1, %v1541_v17 }
 0x6b8   : > { %2211 = vmatmul.msk.bf16.vlgmr.msra.gmra.mxu2 %vm674_vm1, %v1668_v30 }
 0x6f4   : > { %v1379_v46 = vpop.f32.mrf.mxu3 }
 0x6f5   : > { %v1383_v31 = vmul.f32 5.656854, %v1379_v46 }
 0x6f7   : > { %v1384_v32 = vsel %vm674_vm1, %v1383_v31, -inf }
 0x6f8   : > { %1385 = vmax.xlane.f32.xlu1 %v1384_v32 }
 0x6fc   : > { %v1381_v33 = vpop.f32.mrf.mxu3 }
 0x704   : > { %v1500_v34 = vpop.f32.mrf.mxu3 }
 0x705   : > { %v1504_v39 = vmul.f32 5.656854, %v1500_v34 }
 0x707   : > { %v1505_v41 = vsel %vm674_vm1, %v1504_v39, -inf }
 0x70b   : > { %v1317_v35 = vpop.f32.mrf.mxu2 }
 0x70c   : > { %v1321_v36 = vmul.f32 5.656854, %v1317_v35  ;;  %v1502_v37 = vpop.f32.mrf.mxu3 }
 0x70e   : > { %v1322_v38 = vsel %vm674_vm1, %v1321_v36, -inf }
 0x70f   : > { %1323 = vmax.xlane.f32.xlu2 %v1322_v38  ;;  %v1262_v48 = vpop.xlane.xlu0 %1261 }
 0x710   : > { %v1263_v52 = vsub.f32 %v1259_v25, %v1262_v48 }
 0x712   : > { %v1264_v54 = vmul.f32 1.442695, %v1263_v52 }
 0x713   : > { %v1319_v40 = vpop.f32.mrf.mxu2 }
 0x714   : > { %2354 = vpow2.f32 %v1264_v54 }
 0x717   : > { %1506 = vmax.xlane.f32.xlu2 %v1505_v41 }
 0x71a   : > { %v2355_v58 = vpop.eup %2354 }
 0x71b   : > { %v1441_v43 = vpop.f32.mrf.mxu2  ;;  %v1266_v61 = vsel %vm674_vm1, %v2355_v58, 0.0 }
 0x71c   : > { %v1445_v44 = vmul.f32 5.656854, %v1441_v43  ;;  %v1624_v45 = vpop.f32.mrf.mxu3 }
 0x71d   : > { %v1628_v49 = vmul.f32 5.656854, %v1624_v45 }
 0x71e   : > { %v1446_v47 = vsel %vm674_vm1, %v1445_v44, -inf }
 0x71f   : > { %1447 = vmax.xlane.f32.xlu0 %v1446_v47  ;;  %v1629_v53 = vsel %vm674_vm1, %v1628_v49, -inf }
 0x723   : > { %v1443_v50 = vpop.f32.mrf.mxu2 }
 0x724   : > { %v1626_v51 = vpop.f32.mrf.mxu3  ;;  %v1523_v50 = vsel %vm711_vm3, %v2777_v63, 0 }
 0x727   : > { %1630 = vmax.xlane.f32.xlu0 %v1629_v53 }
 0x72b   : > { %v1562_v55 = vpop.f32.mrf.mxu2 }
 0x72c   : > { %v1566_v56 = vmul.f32 5.656854, %v1562_v55 }
 0x72e   : > { %v1567_v57 = vsel %vm674_vm1, %v1566_v56, -inf }
 0x72f   : > { %1568 = vmax.xlane.f32.xlu1 %v1567_v57 }
 0x733   : > { %v1564_v59 = vpop.f32.mrf.mxu2 }
 0x737   : > { %1267 = vadd.xlane.f32.xlu1 %v1266_v61 }
 0x73b   : > { %v1686_v62 = vpop.f32.mrf.mxu2 }
 0x73c   : > { %v1690_v0 = vmul.f32 5.656854, %v1686_v62 }
 0x73e   : > { %v1691_v1 = vsel %vm674_vm1, %v1690_v0, -inf }
 0x73f   : > { %1692 = vmax.xlane.f32.xlu2 %v1691_v1 }
 0x743   : > { %v1688_v3 = vpop.f32.mrf.mxu2 }
 0x76b   : > { %v1386_v4 = vpop.xlane.xlu1 %1385 }
 0x76c   : > { %v1387_v6 = vsub.f32 %v1383_v31, %v1386_v4 }
 0x76e   : > { %v1388_v5 = vmul.f32 1.442695, %v1387_v6 }
 0x770   : > { %2356 = vpow2.f32 %v1388_v5 }
 0x776   : > { %v2357_v8 = vpop.eup %2356 }
 0x777   : > { %v1390_v9 = vsel %vm674_vm1, %v2357_v8, 0.0 }
 0x778   : > { %1391 = vadd.xlane.f32.xlu2 %v1390_v9 }
 0x782   : > { %v1324_v10 = vpop.xlane.xlu2 %1323 }
 0x783   : > { %v1325_v11 = vsub.f32 %v1321_v36, %v1324_v10 }
 0x785   : > { %v1326_v13 = vmul.f32 1.442695, %v1325_v11 }
 0x787   : > { %2358 = vpow2.f32 %v1326_v13 }
 0x78a   : > { %v1507_v42 = vpop.xlane.xlu2 %1506 }
 0x78b   : > { %v1508_v15 = vsub.f32 %v1504_v39, %v1507_v42 }
 0x78d   : > { %v2833_v16 = vpop.eup %2358  ;;  %v1509_v17 = vmul.f32 1.442695, %v1508_v15 }
 0x78e   : > { %v1328_v18 = vsel %vm674_vm1, %v2833_v16, 0.0 }
 0x78f   : > { %2360 = vpow2.f32 %v1509_v17  ;;  %1329 = vadd.xlane.f32.xlu0 %v1328_v18 }
 0x792   : > { %v1448_v2 = vpop.xlane.xlu0 %1447 }
 0x793   : > { %v1449_v20 = vsub.f32 %v1445_v44, %v1448_v2 }
 0x795   : > { %v2837_v19 = vpop.eup %2360  ;;  %v1450_v21 = vmul.f32 1.442695, %v1449_v20 }
 0x796   : > { %v1511_v23 = vsel %vm674_vm1, %v2837_v19, 0.0 }
 0x797   : > { %2362 = vpow2.f32 %v1450_v21  ;;  %1512 = vadd.xlane.f32.xlu0 %v1511_v23 }
 0x79a   : > { %v1631_v24 = vpop.xlane.xlu0 %1630 }
 0x79b   : > { %v1632_v25 = vsub.f32 %v1628_v49, %v1631_v24  ;;  %v1709_v24 = vsel %vm711_vm3, %v2818_v27, 0 }
 0x79d   : > { %v2841_v26 = vpop.eup %2362  ;;  %v1633_v28 = vmul.f32 1.442695, %v1632_v25 }
 0x79e   : > { %v1452_v29 = vsel %vm674_vm1, %v2841_v26, 0.0 }
 0x79f   : > { %2364 = vpow2.f32 %v1633_v28  ;;  %1453 = vadd.xlane.f32.xlu1 %v1452_v29 }
 0x7a2   : > { %v1569_v30 = vpop.xlane.xlu1 %1568 }
 0x7a3   : > { %v1570_v46 = vsub.f32 %v1566_v56, %v1569_v30 }
 0x7a5   : > { %v2845_v31 = vpop.eup %2364  ;;  %v1571_v32 = vmul.f32 1.442695, %v1570_v46 }
 0x7a6   : > { %v1635_v33 = vsel %vm674_vm1, %v2845_v31, 0.0 }
 0x7a7   : > { %2366 = vpow2.f32 %v1571_v32  ;;  %1636 = vadd.xlane.f32.xlu1 %v1635_v33 }
 0x7aa   : > { %v1268_v34 = vpop.xlane.xlu1 %1267 }
 0x7ab   : > { %2368 = vrcp.f32 %v1268_v34 }
 0x7ad   : > { %v2849_v35 = vpop.eup %2366 }
 0x7ae   : > { %v1573_v36 = vsel %vm674_vm1, %v2849_v35, 0.0 }
 0x7af   : > { %1574 = vadd.xlane.f32.xlu2 %v1573_v36 }
 0x7b1   : > { %v2369_v37 = vpop.eup %2368 }
 0x7b2   : > { %v1270_v38 = vmul.f32 %v2369_v37, %v1268_v34  ;;  %v1693_v39 = vpop.xlane.xlu2 %1692 }
 0x7b3   : > { %v1694_v40 = vsub.f32 %v1690_v0, %v1693_v39 }
 0x7b4   : > { %v1271_v41 = vsub.f32 2.0, %v1270_v38 }
 0x7b5   : > { %v1695_v43 = vmul.f32 1.442695, %v1694_v40 }
 0x7b6   : > { %v1272_v44 = vmul.f32 %v2369_v37, %v1271_v41 }
 0x7b7   : > { %2370 = vpow2.f32 %v1695_v43 }
 0x7b8   : > { %v1273_v45 = vmul.f32 %v2355_v58, %v1272_v44  ;;  %v1647_v58 = vsel %vm711_vm3, %v2807_v14, 0  ;;  %v1585_v14 = vsel %vm711_vm3, %v2811_v12, 0 }
 0x7ba   : > { %v1274_v47 = vpack.c.bf16 %v1273_v45, %v1273_v45 }
 0x7bc   : > { %2198 = vmatmul.msk.bf16.vlgmr.msra.gmra.mxu0 %vm674_vm1, %v1274_v47 }
 0x7bd   : > { %v2854_v48 = vpop.eup %2370  ;;  %1532 = vmatpush.bf16.msra.mxu0 %v1523_v50 }
 0x7be   : > { %v1697_v49 = vsel %vm674_vm1, %v2854_v48, 0.0 }
 0x7bf   : > { %1698 = vadd.xlane.f32.xlu0 %v1697_v49 }
 0x7eb   : > { %v1392_v51 = vpop.xlane.xlu2 %1391 }
 0x7ec   : > { %2372 = vrcp.f32 %v1392_v51 }
 0x7f2   : > { %v2373_v52 = vpop.eup %2372 }
 0x7f3   : > { %v1394_v53 = vmul.f32 %v2373_v52, %v1392_v51 }
 0x7f5   : > { %v1395_v54 = vsub.f32 2.0, %v1394_v53 }
 0x7f7   : > { %v1396_v55 = vmul.f32 %v2373_v52, %v1395_v54 }
 0x7f9   : > { %v1397_v56 = vmul.f32 %v2357_v8, %v1396_v55 }
 0x7fb   : > { %v1398_v57 = vpack.c.bf16 %v1397_v56, %v1397_v56 }
 0x7fd   : > { %2202 = vmatmul.msk.bf16.vlgmr.msrb.gmra.mxu0 %vm674_vm1, %v1398_v57 }
 0x7fe   : > { %1656 = vmatpush.bf16.msrb.mxu0 %v1647_v58 }
 0x802   : > { %v1330_v59 = vpop.xlane.xlu0 %1329 }
 0x803   : > { %2374 = vrcp.f32 %v1330_v59 }
 0x809   : > { %v2375_v61 = vpop.eup %2374 }
 0x80a   : > { %v1332_v62 = vmul.f32 %v2375_v61, %v1330_v59  ;;  %v1513_v63 = vpop.xlane.xlu0 %1512 }
 0x80b   : > { %2376 = vrcp.f32 %v1513_v63 }
 0x80c   : > { %v1333_v0 = vsub.f32 2.0, %v1332_v62  ;;  %v2274_v62 = vld [vmem:[%s2998_s24 + $0x8] sm:$0xff] }
 0x80d   : > { %1753 = vmatpush.bf16.msra.mxu3 %v2274_v62 }
 0x80e   : > { %v1334_v1 = vmul.f32 %v2375_v61, %v1333_v0 }
 0x810   : > { %v1335_v3 = vmul.f32 %v2833_v16, %v1334_v1 }
 0x811   : > { %v2377_v4 = vpop.eup %2376 }
 0x812   : > { %v1336_v6 = vpack.c.bf16 %v1335_v3, %v1335_v3  ;;  %v1515_v5 = vmul.f32 %v2377_v4, %v1513_v63  ;;  %v1454_v8 = vpop.xlane.xlu1 %1453  ;;  %v2273_v63 = vld [vmem:[%s2998_s24] sm:$0xff] }
 0x813   : > { %2378 = vrcp.f32 %v1454_v8  ;;  %1754 = vmatpush.bf16.msra.mxu3 %v2273_v63  ;;  %v2312_v63 = vld [vmem:[%s638_s30] ss:$0 sm:$0xff] }
 0x814   : > { %v1516_v9 = vsub.f32 2.0, %v1515_v5  ;;  %2200 = vmatmul.msk.bf16.vlgmr.msra.gmra.mxu1 %vm674_vm1, %v1336_v6 }
 0x815   : > { %1594 = vmatpush.bf16.msra.mxu1 %v1585_v14 }
 0x816   : > { %v1517_v10 = vmul.f32 %v2377_v4, %v1516_v9 }
 0x818   : > { %v1518_v11 = vmul.f32 %v2837_v19, %v1517_v10 }
 0x819   : > { %v2379_v13 = vpop.eup %2378 }
 0x81a   : > { %v1519_v42 = vpack.c.bf16 %v1518_v11, %v1518_v11  ;;  %v1456_v15 = vmul.f32 %v2379_v13, %v1454_v8  ;;  %v1637_v17 = vpop.xlane.xlu1 %1636 }
 0x81b   : > { %2380 = vrcp.f32 %v1637_v17 }
 0x81c   : > { %v1457_v16 = vsub.f32 2.0, %v1456_v15  ;;  %2206 = vmatmul.msk.bf16.vlgmr.msra.gmra.mxu0 %vm674_vm1, %v1519_v42 }
 0x81e   : > { %v1458_v18 = vmul.f32 %v2379_v13, %v1457_v16 }
 0x820   : > { %v1459_v2 = vmul.f32 %v2841_v26, %v1458_v18 }
 0x821   : > { %v2381_v20 = vpop.eup %2380 }
 0x822   : > { %v1460_v12 = vpack.c.bf16 %v1459_v2, %v1459_v2  ;;  %v1639_v21 = vmul.f32 %v2381_v20, %v1637_v17  ;;  %v1575_v23 = vpop.xlane.xlu2 %1574 }
 0x823   : > { %2382 = vrcp.f32 %v1575_v23 }
 0x824   : > { %v1640_v19 = vsub.f32 2.0, %v1639_v21  ;;  %2204 = vmatmul.msk.bf16.vlgmr.msrb.gmra.mxu1 %vm674_vm1, %v1460_v12 }
 0x825   : > { %1718 = vmatpush.bf16.msrb.mxu1 %v1709_v24 }
 0x826   : > { %v1641_v25 = vmul.f32 %v2381_v20, %v1640_v19 }
 0x828   : > { %v1642_v28 = vmul.f32 %v2845_v31, %v1641_v25  ;;  %v2275_v25 = vld [vmem:[%s2567_s3] sm:$0xff] }
 0x829   : > { %v2383_v29 = vpop.eup %2382 }
 0x82a   : > { %v1643_v30 = vpack.c.bf16 %v1642_v28, %v1642_v28  ;;  %v1577_v46 = vmul.f32 %v2383_v29, %v1575_v23  ;;  %v2276_v23 = vld [vmem:[%s2567_s3 + $0x8] sm:$0xff]  ;;  %v2284_v28 = vld [vmem:[%s2577_s18 + $0x38] sm:$0xff]  ;;  %s3002_s3 = scalar_lea.vmem %s2979_s14, %s2535_s20 }
 0x82b   : > { %1847 = vmatpush.bf16.msra.mxu0 %v2276_v23  ;;  %1926 = vmatpush.bf16.msrb.mxu2 %v2284_v28 }
 0x82c   : > { %v1578_v32 = vsub.f32 2.0, %v1577_v46  ;;  %2210 = vmatmul.msk.bf16.vlgmr.msrb.gmra.mxu0 %vm674_vm1, %v1643_v30  ;;  %v2283_v46 = vld [vmem:[%s2577_s18 + $0x30] sm:$0xff] }
 0x82e   : > { %v1579_v26 = vmul.f32 %v2383_v29, %v1578_v32 }
 0x82f   : > { %1848 = vmatpush.bf16.msra.mxu0 %v2275_v25  ;;  %1927 = vmatpush.bf16.msrb.mxu2 %v2283_v46 }
 0x830   : > { %v1580_v33 = vmul.f32 %v2849_v35, %v1579_v26 }
 0x832   : > { %v1581_v34 = vpack.c.bf16 %v1580_v33, %v1580_v33  ;;  %v1699_v36 = vpop.xlane.xlu0 %1698 }
 0x833   : > { %2384 = vrcp.f32 %v1699_v36 }
 0x834   : > { %2208 = vmatmul.msk.bf16.vlgmr.msra.gmra.mxu1 %vm674_vm1, %v1581_v34  ;;  %v2282_v34 = vld [vmem:[%s2577_s18 + $0x28] sm:$0xff] }
 0x835   : > { %1928 = vmatpush.bf16.msrb.mxu2 %v2282_v34 }
 0x839   : > { %v2385_v27 = vpop.eup %2384  ;;  %v1289_v37 = vpop.f32.mrf.mxu0 }
 0x83a   : > { %v1701_v38 = vmul.f32 %v2385_v27, %v1699_v36  ;;  %1293 = vst.msk [vmem:[#allocation2] sm:$0xff] %vm674_vm1, %v1289_v37  ;;  %v2281_v37 = vld [vmem:[%s2577_s18 + $0x20] sm:$0xff] }
 0x83b   : > { %1929 = vmatpush.bf16.msrb.mxu2 %v2281_v37 }
 0x83c   : > { %v1702_v31 = vsub.f32 2.0, %v1701_v38 }
 0x83e   : > { %v1703_v39 = vmul.f32 %v2385_v27, %v1702_v31 }
 0x840   : > { %v1704_v40 = vmul.f32 %v2854_v48, %v1703_v39 }
 0x841   : > { %v1291_v41 = vpop.f32.mrf.mxu0 }
 0x842   : > { %v1705_v43 = vpack.c.bf16 %v1704_v40, %v1704_v40 }
 0x844   : > { %2212 = vmatmul.msk.bf16.vlgmr.msrb.gmra.mxu1 %vm674_vm1, %v1705_v43 }
 0x87a   : > { %v1413_v44 = vpop.f32.mrf.mxu0 }
 0x87b   : > { %1418 = vrot.lane.b32.xlu0 %v1413_v44, %s2438_s6 }
 0x882   : > { %v1415_v35 = vpop.f32.mrf.mxu0 }
 0x891   : > { %v1351_v45 = vpop.f32.mrf.mxu1 }
 0x892   : > { %1356 = vrot.lane.b32.xlu2 %v1351_v45, %s2437_s29  ;;  %v2310_v45 = vld [vmem:[%s2999_s21] ss:$0 sm:$0xff]  ;;  %s2005_s21 = sshll.u32 %s2441_s23, 4  ;;  %s2006_s21 = int_to_ptr.vmem [resolvable:$true] %s2005_s21 }
 0x899   : > { %v1353_v47 = vpop.f32.mrf.mxu1  ;;  %v1534_v49 = vpop.f32.mrf.mxu0 }
 0x89a   : > { %1538 = vst.msk [vmem:[#allocation2 + $0x8] sm:$0xff] %vm674_vm1, %v1534_v49 }
 0x8a1   : > { %v1475_v50 = vpop.f32.mrf.mxu1  ;;  %v1536_v51 = vpop.f32.mrf.mxu0 }
 0x8a2   : > { %1480 = vrot.lane.b32.xlu0 %v1475_v50, %s2439_s16  ;;  %v2311_v51 = vld [vmem:[%s3000_s26] ss:$0 sm:$0xff] }
 0x8a9   : > { %v1477_v48 = vpop.f32.mrf.mxu1  ;;  %v1658_v52 = vpop.f32.mrf.mxu0 }
 0x8aa   : > { %1663 = vrot.lane.b32.xlu2 %v1658_v52, %s2438_s6 }
 0x8b1   : > { %v1596_v53 = vpop.f32.mrf.mxu1  ;;  %v1660_v54 = vpop.f32.mrf.mxu0 }
 0x8b2   : > { %1601 = vrot.lane.b32.xlu1 %v1596_v53, %s2437_s29 }
 0x8b9   : > { %v1598_v55 = vpop.f32.mrf.mxu1 }
 0x8c1   : > { %v1720_v56 = vpop.f32.mrf.mxu1 }
 0x8c2   : > { %1725 = vrot.lane.b32.xlu1 %v1720_v56, %s2439_s16 }
 0x8c9   : > { %v1722_v57 = vpop.f32.mrf.mxu1 }
 0x8ca   : > { %v2280_v57 = vld [vmem:[%s2577_s18 + $0x18] sm:$0xff] }
 0x8cb   : > { %1930 = vmatpush.bf16.msrb.mxu2 %v2280_v57 }
 0x8ec   : > { %v1357_v58 = vpop.permute.xlu2 %1356 }
 0x8ed   : > { %1359 = vst.msk [vmem:[#allocation2] sm:$0xff] %vm786_vm5, %v1357_v58  ;;  %v1419_v59 = vpop.permute.xlu0 %1418  ;;  %v2279_v58 = vld [vmem:[%s2577_s18 + $0x10] sm:$0xff] }
 0x8ee   : > { %1421 = vst.msk [vmem:[#allocation2] sm:$0xff] %vm845_vm6, %v1419_v59  ;;  %1931 = vmatpush.bf16.msrb.mxu2 %v2279_v58  ;;  %v2278_v59 = vld [vmem:[%s2577_s18 + $0x8] sm:$0xff] }
 0x8f2   : > { %1932 = vmatpush.bf16.msrb.mxu2 %v2278_v59 }
 0x904   : > { %v1664_v1 = vpop.permute.xlu2 %1663 }
 0x914   : > { %v1481_v61 = vpop.permute.xlu0 %1480 }
 0x915   : > { %1483 = vst.msk [vmem:[#allocation2] sm:$0xff] %vm904_vm7, %v1481_v61  ;;  %v2277_v61 = vld [vmem:[%s2577_s18] sm:$0xff] }
 0x916   : > { %1933 = vmatpush.bf16.msrb.mxu2 %v2277_v61 }
 0x91c   : > { %v1729_v4 = vld [vmem:[#allocation2] sm:$0xff] }
 0x924   : > { %v1602_v0 = vpop.permute.xlu1 %1601 }
 0x925   : > { %1604 = vst.msk [vmem:[#allocation2 + $0x8] sm:$0xff] %vm786_vm5, %v1602_v0 }
 0x926   : > { %1666 = vst.msk [vmem:[#allocation2 + $0x8] sm:$0xff] %vm845_vm6, %v1664_v1 }
 0x934   : > { %v1726_v3 = vpop.permute.xlu1 %1725 }
 0x935   : > { %1728 = vst.msk [vmem:[#allocation2 + $0x8] sm:$0xff] %vm904_vm7, %v1726_v3 }
 0x93c   : > { %v1730_v6 = vld [vmem:[#allocation2 + $0x8] sm:$0xff] }
 0x93d   : > { %v1731_v5 = vpack.c.bf16 %v1730_v6, %v1729_v4 }
 0x93f   : > { %2221 = vmatmul.msk.bf16.vlgmr.msra.gmra.mxu3 %vm1152_vm8, %v1731_v5 }
 0x9c2   : > { %v1756_v8 = vpop.f32.mrf.mxu3 }
 0x9c3   : > { %v1757_v14 = vadd.f32 %v1756_v8, %v2770_v60  ;;  %v2313_v8 = vld [vmem:[%s646_s22] ss:$0 sm:$0xff]  ;;  %s3001_s22 = scalar_lea.vmem %s2978_s13, %s2535_s20  ;;  %s3003_s20 = sld [smem:[#allocation12_spill]] }
 0x9c5   : > { %v1763_v9 = vsel %vm1152_vm8, %v1757_v14, 0.0 }
 0x9c6   : > { %1764 = vadd.xlane.f32.xlu2 %v1763_v9 }
 0x9c9   : > { %s2007_s26 = sshll.u32 %s3003_s20, 4  ;;  %s2008_s26 = int_to_ptr.hbm [resolvable:$true] %s2007_s26 }
 0x9ca   : > { %v1758_v10 = vpop.f32.mrf.mxu3 }
 0x9cb   : > { %v1759_v11 = vadd.f32 %v1758_v10, %v2785_v7 }
 0x9cd   : > { %v1766_v13 = vsel %vm1152_vm8, %v1759_v11, 0.0 }
 0x9ce   : > { %1767 = vadd.xlane.f32.xlu0 %v1766_v13 }
 0xa39   : > { %v1765_v42 = vpop.xlane.xlu2 %1764 }
 0xa3a   : > { %v1769_v15 = vmul.f32 %v1765_v42, %v2746_v22 }
 0xa3c   : > { %v1771_v17 = vsub.f32 %v1757_v14, %v1769_v15 }
 0xa3e   : > { %v1773_v16 = vmul.f32 %v1771_v17, %v1771_v17 }
 0xa40   : > { %v1775_v18 = vsel %vm1152_vm8, %v1773_v16, 0.0 }
 0xa41   : > { %v1768_v60 = vpop.xlane.xlu0 %1767  ;;  %1776 = vadd.xlane.f32.xlu1 %v1775_v18 }
 0xa42   : > { %v1770_v2 = vmul.f32 %v1768_v60, %v2746_v22 }
 0xa44   : > { %v1772_v20 = vsub.f32 %v1759_v11, %v1770_v2 }
 0xa46   : > { %v1774_v7 = vmul.f32 %v1772_v20, %v1772_v20 }
 0xa48   : > { %v1778_v12 = vsel %vm1152_vm8, %v1774_v7, 0.0 }
 0xa49   : > { %1779 = vadd.xlane.f32.xlu2 %v1778_v12 }
 0xab4   : > { %v1777_v21 = vpop.xlane.xlu1 %1776 }
 0xab5   : > { %v1781_v24 = vmul.f32 %v1777_v21, %v2746_v22 }
 0xab7   : > { %v1783_v19 = vadd.f32 1e-05, %v1781_v24 }
 0xab9   : > { %2386 = vrsqrt.f32 %v1783_v19  ;;  %vm1791_vm1 = vweird.f32 %v1783_v19 }
 0xabc   : > { %v1780_v29 = vpop.xlane.xlu2 %1779 }
 0xabd   : > { %v1782_v30 = vmul.f32 %v1780_v29, %v2746_v22 }
 0xabf   : > { %v2387_v32 = vpop.eup %2386  ;;  %v1784_v26 = vadd.f32 1e-05, %v1782_v30 }
 0xac0   : > { %v1786_v33 = vmul.f32 %v2387_v32, %v1783_v19  ;;  %vm1792_vm0 = vweird.f32 %v2387_v32 }
 0xac1   : > { %2388 = vrsqrt.f32 %v1784_v26  ;;  %vm1793_vm2 = vmor %vm1791_vm1, %vm1792_vm0  ;;  %vm1801_vm4 = vweird.f32 %v1784_v26 }
 0xac2   : > { %v1787_v36 = vmul.f32 %v2387_v32, %v1786_v33 }
 0xac4   : > { %v1788_v27 = vmul.f32 0.5, %v1787_v36 }
 0xac6   : > { %v1789_v38 = vsub.f32 1.5, %v1788_v27 }
 0xac7   : > { %v2389_v31 = vpop.eup %2388 }
 0xac8   : > { %v1790_v39 = vmul.f32 %v2387_v32, %v1789_v38  ;;  %v1796_v40 = vmul.f32 %v2389_v31, %v1784_v26  ;;  %vm1802_vm3 = vweird.f32 %v2389_v31 }
 0xac9   : > { %vm1803_vm5 = vmor %vm1801_vm4, %vm1802_vm3 }
 0xaca   : > { %v1797_v41 = vmul.f32 %v2389_v31, %v1796_v40  ;;  %v1794_v43 = vsel %vm1793_vm2, %v2387_v32, %v1790_v39  ;;  %v2315_v40 = vld [vmem:[%s3002_s3] ss:$0 sm:$0xff] }
 0xacb   : > { %v1805_v47 = vmul.f32 %v1794_v43, %v1771_v17 }
 0xacc   : > { %v1798_v44 = vmul.f32 0.5, %v1797_v41 }
 0xacd   : > { %v1810_v48 = vmul.f32 %v2310_v45, %v1805_v47 }
 0xace   : > { %v1799_v35 = vsub.f32 1.5, %v1798_v44 }
 0xacf   : > { %v1815_v54 = vadd.f32 %v2311_v51, %v1810_v48 }
 0xad0   : > { %v1800_v49 = vmul.f32 %v2389_v31, %v1799_v35 }
 0xad2   : > { %v1804_v50 = vsel %vm1803_vm5, %v2389_v31, %v1800_v49  ;;  %v2314_v31 = vld [vmem:[%s3001_s22] ss:$0 sm:$0xff] }
 0xad3   : > { %v1806_v52 = vmul.f32 %v1804_v50, %v1772_v20 }
 0xad5   : > { %v1811_v53 = vmul.f32 %v2310_v45, %v1806_v52 }
 0xad7   : > { %v1816_v55 = vadd.f32 %v2311_v51, %v1811_v53 }
 0xad9   : > { %v1817_v56 = vpack.c.bf16 %v1816_v55, %v1815_v54 }
 0xadb   : > { %2230 = vmatmul.msk.bf16.vlgmr.msra.gmra.mxu0 %vm1152_vm8, %v1817_v56 }
 0xb58   : > { %v1850_v62 = vpop.f32.mrf.mxu0 }
 0xb59   : > { %v1851_v0 = vadd.f32 %v2312_v63, %v1850_v62 }
 0xb5b   : > { %v1855_v4 = vmax.f32 %v1851_v0, 0.0 }
 0xb60   : > { %v1852_v1 = vpop.f32.mrf.mxu0 }
 0xb61   : > { %v1853_v3 = vadd.f32 %v2312_v63, %v1852_v1 }
 0xb63   : > { %v1856_v6 = vmax.f32 %v1853_v3, 0.0 }
 0xb65   : > { %v1857_v5 = vpack.c.bf16 %v1856_v6, %v1855_v4 }
 0xb67   : > { %1934 = vmatmul.bf16.vlgmr.msrb.gmra.mxu2 %v1857_v5 }
 0xbea   : > { %v1935_v14 = vpop.f32.mrf.mxu2 }
 0xbeb   : > { %v1936_v9 = vadd.f32 %v2313_v8, %v1935_v14 }
 0xbed   : > { %v1940_v10 = vadd.f32 %v1936_v9, %v1815_v54 }
 0xbef   : > { %v1944_v11 = vsel %vm1152_vm8, %v1940_v10, 0.0 }
 0xbf0   : > { %1945 = vadd.xlane.f32.xlu0 %v1944_v11 }
 0xbf2   : > { %v1937_v13 = vpop.f32.mrf.mxu2 }
 0xbf3   : > { %v1938_v42 = vadd.f32 %v2313_v8, %v1937_v13 }
 0xbf5   : > { %v1941_v15 = vadd.f32 %v1938_v42, %v1816_v55 }
 0xbf7   : > { %v1947_v17 = vsel %vm1152_vm8, %v1941_v15, 0.0 }
 0xbf8   : > { %1948 = vadd.xlane.f32.xlu1 %v1947_v17 }
 0xc63   : > { %v1946_v16 = vpop.xlane.xlu0 %1945 }
 0xc64   : > { %v1950_v18 = vmul.f32 %v1946_v16, %v2746_v22 }
 0xc66   : > { %v1952_v60 = vsub.f32 %v1940_v10, %v1950_v18 }
 0xc68   : > { %v1954_v2 = vmul.f32 %v1952_v60, %v1952_v60 }
 0xc6a   : > { %v1956_v20 = vsel %vm1152_vm8, %v1954_v2, 0.0 }
 0xc6b   : > { %v1949_v7 = vpop.xlane.xlu1 %1948  ;;  %1957 = vadd.xlane.f32.xlu2 %v1956_v20 }
 0xc6c   : > { %v1951_v12 = vmul.f32 %v1949_v7, %v2746_v22 }
 0xc6e   : > { %v1953_v21 = vsub.f32 %v1941_v15, %v1951_v12 }
 0xc70   : > { %v1955_v23 = vmul.f32 %v1953_v21, %v1953_v21 }
 0xc72   : > { %v1959_v24 = vsel %vm1152_vm8, %v1955_v23, 0.0 }
 0xc73   : > { %1960 = vadd.xlane.f32.xlu0 %v1959_v24 }
 0xcde   : > { %v1958_v19 = vpop.xlane.xlu2 %1957 }
 0xcdf   : > { %v1962_v25 = vmul.f32 %v1958_v19, %v2746_v22 }
 0xce1   : > { %v1964_v28 = vadd.f32 1e-05, %v1962_v25 }
 0xce3   : > { %2390 = vrsqrt.f32 %v1964_v28  ;;  %vm1972_vm7 = vweird.f32 %v1964_v28 }
 0xce6   : > { %v1961_v29 = vpop.xlane.xlu0 %1960 }
 0xce7   : > { %v1963_v30 = vmul.f32 %v1961_v29, %v2746_v22 }
 0xce9   : > { %v2391_v46 = vpop.eup %2390  ;;  %v1965_v32 = vadd.f32 1e-05, %v1963_v30 }
 0xcea   : > { %v1967_v26 = vmul.f32 %v2391_v46, %v1964_v28  ;;  %vm1973_vm6 = vweird.f32 %v2391_v46 }
 0xceb   : > { %2392 = vrsqrt.f32 %v1965_v32  ;;  %vm1974_vm9 = vmor %vm1972_vm7, %vm1973_vm6  ;;  %vm1982_vm11 = vweird.f32 %v1965_v32 }
 0xcec   : > { %v1968_v33 = vmul.f32 %v2391_v46, %v1967_v26 }
 0xcee   : > { %v1969_v34 = vmul.f32 0.5, %v1968_v33 }
 0xcf0   : > { %v1970_v36 = vsub.f32 1.5, %v1969_v34 }
 0xcf1   : > { %v2393_v27 = vpop.eup %2392 }
 0xcf2   : > { %v1971_v37 = vmul.f32 %v2391_v46, %v1970_v36  ;;  %v1977_v38 = vmul.f32 %v2393_v27, %v1965_v32  ;;  %vm1983_vm10 = vweird.f32 %v2393_v27 }
 0xcf3   : > { %vm1984_vm12 = vmor %vm1982_vm11, %vm1983_vm10 }
 0xcf4   : > { %v1975_v22 = vsel %vm1974_vm9, %v2391_v46, %v1971_v37  ;;  %v1978_v39 = vmul.f32 %v2393_v27, %v1977_v38 }
 0xcf5   : > { %v1986_v41 = vmul.f32 %v1975_v22, %v1952_v60 }
 0xcf6   : > { %v1979_v43 = vmul.f32 0.5, %v1978_v39 }
 0xcf7   : > { %v1991_v44 = vmul.f32 %v2314_v31, %v1986_v41 }
 0xcf8   : > { %v1980_v35 = vsub.f32 1.5, %v1979_v43 }
 0xcf9   : > { %v1996_v45 = vadd.f32 %v2315_v40, %v1991_v44 }
 0xcfa   : > { %v1981_v47 = vmul.f32 %v2393_v27, %v1980_v35 }
 0xcfb   : > { %1998 = vst.msk [vmem:[#allocation3] sm:$0xff] %vm1152_vm8, %v1996_v45 }
 0xcfc   : > { %v1985_v49 = vsel %vm1984_vm12, %v2393_v27, %v1981_v47 }
 0xcfd   : > { %v1987_v50 = vmul.f32 %v1985_v49, %v1953_v21 }
 0xcff   : > { %v1992_v51 = vmul.f32 %v2314_v31, %v1987_v50 }
 0xd01   : > { %v1997_v48 = vadd.f32 %v2315_v40, %v1992_v51 }
 0xd03   : > { %1999 = vst.msk [vmem:[#allocation3 + $0x8] sm:$0xff] %vm1152_vm8, %v1997_v48 }
 0xd04   : > { %2286 = dma.vmem_to_hbm [thread:$0]  (%p2289_p5), %s2006_s21, 256, %s2008_s26, [#allocation4], %s2442_s28, %s2442_s28, %s2437_s29  }
 0xd05   : > { %2427 = dma.done.wait (%p2289_p5), [#allocation4], 256  }
 0xd06   : > { %2429 = vsyncadd (%p2289_p5), [#allocation4], 4294967040 }
 0xd07 PF: > { %s3004_s27 = sld [smem:[#allocation6_spill]] }
 0xd0d   : > { %s26_s18 = sadd.s32 1, %s3004_s27  }
 0xd0e   : > { %p23_p6 = scmp.ge.s32.totalorder %s26_s18, 4  }
 0xd10   :  { %25 = sbr.rel (!%p23_p6) target bundleno = 7 (0x7), region = 145 }
 0xd15   :  { %2024 = vsyncpa [#allocation4], 1 }
 0xd16   :  { %2026 = vsyncpa [#allocation4 + $0x1], 1 }

</bundles_post_ra>
